<compile_context>
chip_gen: v7x
topology: tpu7x:2x2x1
jax: 0.10.0
libtpu: 0.0.40
codegen_flags: <defaults>
</compile_context>

<pallas_src>
import jax
import jax.numpy as jnp
import numpy as np
from jax.experimental import pallas as pl
from jax.experimental.pallas import tpu as pltpu

LN_EPS = 1e-5


def _round_up(x, m):
    return ((x + m - 1) // m) * m


def _pick_tiles(n):
    """Padded node count + (i, k) tile sizes for the adjacency stream."""
    # Pad to a multiple of 512 only when the graph is large enough that the extra
    # zero rows/cols are cheap; small graphs stay at 128 granularity.
    np_ = _round_up(n, 512) if n >= 1024 else _round_up(n, 128)
    tile_k = next(t for t in (512, 256, 128) if np_ % t == 0)   # big streamed k-tile
    tile_i = next(t for t in (256, 128) if np_ % t == 0)        # smaller i-tile (VMEM)
    tile_i = min(tile_i, tile_k)
    return np_, tile_i, tile_k


def prepare_graph(adj):
    """Per-graph preprocessing, computed once and reused across layers / steps.

    adj: [N, N] dense adjacency with adj[dst, src] = 1.0.
    """
    adj = jnp.asarray(adj, jnp.float32)
    n = adj.shape[0]
    np_, tile_i, tile_k = _pick_tiles(n)
    n_it, n_kt = np_ // tile_i, np_ // tile_k

    adj_p = jnp.zeros((np_, np_), jnp.float32).at[:n, :n].set(adj)

    # DGL-style symmetric norm (clamp(min=1)); padded rows get norm 1 (features are 0).
    src_norm = jax.lax.rsqrt(jnp.maximum(jnp.sum(adj_p, axis=0), 1.0))[:, None]  # out-deg
    dst_norm = jax.lax.rsqrt(jnp.maximum(jnp.sum(adj_p, axis=1), 1.0))[:, None]  # in-deg

    # Block-sparsity tables: for every dst row-tile, the nonzero adjacency k-tiles
    # packed to the front; skipped steps repeat the last valid index so the pipeline
    # issues no DMA for them.
    blk_nz = jnp.any(adj_p.reshape(n_it, tile_i, n_kt, tile_k) != 0.0, axis=(1, 3))
    cnt = jnp.sum(blk_nz, axis=1).astype(jnp.int32)                          # [n_it]
    order = jnp.argsort((~blk_nz).astype(jnp.int32), axis=1).astype(jnp.int32)
    last_valid = jnp.take_along_axis(order, jnp.maximum(cnt - 1, 0)[:, None], axis=1)
    ks = jnp.arange(n_kt, dtype=jnp.int32)[None, :]
    kidx = jnp.where(ks < cnt[:, None], order, last_valid).astype(jnp.int32)  # [n_it,n_kt]

    return {
        "n": n, "np": np_, "tile_i": tile_i, "tile_k": tile_k,
        # bf16 is lossless for a 0/1 adjacency and halves the dominant HBM stream.
        # TODO(synk): on v7x an fp8(e4m3) adjacency (also exact for 0/1) would halve it again.
        "adj": adj_p.astype(jnp.bfloat16),
        "src_norm": src_norm.astype(jnp.float32),
        "dst_norm": dst_norm.astype(jnp.float32),
        "kcnt": cnt, "kidx": kidx,
    }


def graphconv_forward(graph, feat, w_fc, b_fc, w_res, ln_w, ln_b):
    """graph: output of prepare_graph().  feat: [N, Din].  Returns [N, Dout]."""
    f32, bf16 = jnp.float32, jnp.bfloat16
    n, np_ = graph["n"], graph["np"]
    tile_i, tile_k = graph["tile_i"], graph["tile_k"]
    n_it, n_kt = np_ // tile_i, np_ // tile_k

    feat = jnp.asarray(feat, f32)
    din = feat.shape[1]
    dout = w_fc.shape[0]
    din_p, dout_p = _round_up(din, 128), _round_up(dout, 128)

    # ---- padded operands (feat stays f32 and is made VMEM-resident; weights bf16) ----
    # NOTE: for very large N*Din that would not fit VMEM, switch the feat spec to a
    # streamed pre-scaled bf16 copy instead of a resident block.
    feat_p = jnp.zeros((np_, din_p), f32).at[:n, :din].set(feat)
    wfc_t = jnp.zeros((din_p, dout_p), bf16).at[:din, :dout].set(
        jnp.asarray(w_fc, f32).T.astype(bf16))
    wres_t = jnp.zeros((din_p, dout_p), bf16).at[:din, :dout].set(
        jnp.asarray(w_res, f32).T.astype(bf16))
    bfc = jnp.zeros((1, dout_p), f32).at[0, :dout].set(jnp.asarray(b_fc, f32))
    lnw = jnp.zeros((1, dout_p), f32).at[0, :dout].set(jnp.asarray(ln_w, f32))
    lnb = jnp.zeros((1, dout_p), f32).at[0, :dout].set(jnp.asarray(ln_b, f32))
    col_mask = (jnp.arange(dout_p) < dout).astype(f32).reshape(1, dout_p)

    inv_dout = 1.0 / float(dout)

    def kernel(kcnt_ref, kidx_ref,                         # scalar prefetch (SMEM)
               adj_ref, feat_ref, snorm_ref, dnorm_ref,
               wfc_ref, wres_ref, bfc_ref, lnw_ref, lnb_ref, mask_ref,
               out_ref, acc_ref):
        i = pl.program_id(0)
        k = pl.program_id(1)

        @pl.when(k == 0)
        def _():
            acc_ref[...] = jnp.zeros_like(acc_ref)

        # Accumulate only over the prefetched nonzero adjacency blocks; for k >= kcnt
        # the adjacency index_map repeats the previous block so no DMA is issued.
        @pl.when(k < kcnt_ref[i])
        def _():
            kk = kidx_ref[i, k]
            s = pl.multiple_of(kk * tile_k, tile_k)
            # src-side out-degree norm fused here (cheap VPU filler under the MXU);
            # bf16 cast -> native bf16 MXU path, f32 accumulation.
            h = (feat_ref[pl.ds(s, tile_k), :] *
                 snorm_ref[pl.ds(s, tile_k), :]).astype(jnp.bfloat16)
            acc_ref[...] += jnp.dot(adj_ref[...], h,
                                    preferred_element_type=jnp.float32)

        @pl.when(k == pl.num_programs(1) - 1)
        def _():
            si = pl.multiple_of(i * tile_i, tile_i)
            dnorm = dnorm_ref[pl.ds(si, tile_i), :]                   # [tile_i, 1]
            fdst = feat_ref[pl.ds(si, tile_i), :]                     # residual rows
            # ((agg @ W) + b) * dn == (agg * dn) @ W + b * dn   (dn is per-row)
            y = jnp.dot((acc_ref[...] * dnorm).astype(jnp.bfloat16), wfc_ref[...],
                        preferred_element_type=jnp.float32)
            y = y + jnp.dot(fdst.astype(jnp.bfloat16), wres_ref[...],
                            preferred_element_type=jnp.float32)
            y = y + bfc_ref[...] * dnorm

            # LayerNorm over the real (unpadded) Dout channels only
            mask = mask_ref[...]
            y = y * mask
            mean = jnp.sum(y, axis=-1, keepdims=True) * inv_dout
            centered = (y - mean) * mask
            var = jnp.sum(centered * centered, axis=-1, keepdims=True) * inv_dout
            y = centered * jax.lax.rsqrt(var + LN_EPS)
            y = y * lnw_ref[...] + lnb_ref[...]
            out_ref[...] = jnp.maximum(y, 0.0).astype(out_ref.dtype)

    # ---- advisory cost (actual traffic: feat fetched once, adjacency upper bound) ----
    flops = 2 * np_ * np_ * din_p + 2 * 2 * np_ * din_p * dout_p
    bytes_accessed = (np_ * np_ * 2              # bf16 adjacency (upper bound, pre-skip)
                      + np_ * din_p * 4          # resident feat, fetched once
                      + np_ * dout_p * 4         # output
                      + 2 * din_p * dout_p * 2   # bf16 weights
                      + 2 * np_ * 4)             # degree norms
    cost = pl.CostEstimate(flops=int(flops), transcendentals=int(np_),
                           bytes_accessed=int(bytes_accessed))

    # ---- explicit VMEM budget (v5e scoped default is 16 MiB; cap at v7x's 64 MiB) ----
    vmem_need = (2 * tile_i * tile_k * 2                  # adj tile (double-buffered bf16)
                 + 2 * np_ * din_p * 4                    # resident feat
                 + 2 * 2 * np_ * 128 * 4                  # norms (lane-padded)
                 + 2 * 2 * din_p * dout_p * 2             # resident bf16 weights
                 + 2 * tile_i * dout_p * 4                # output block
                 + tile_i * din_p * 4                     # f32 accumulator scratch
                 + (2 << 20))                             # small residents + slack
    vmem_limit = int(min(max(vmem_need, 32 << 20), 64 << 20))

    cmap = lambda idx: (lambda i, k, cnt, kid: idx)       # constant-index residents

    out_p = pl.pallas_call(
        kernel,
        out_shape=jax.ShapeDtypeStruct((np_, dout_p), f32),
        grid_spec=pltpu.PrefetchScalarGridSpec(
            num_scalar_prefetch=2,
            grid=(n_it, n_kt),
            in_specs=[
                # adjacency: data-dependent k index -> all-zero blocks are never DMA'd
                pl.BlockSpec((tile_i, tile_k), lambda i, k, cnt, kid: (i, kid[i, k])),
                pl.BlockSpec((np_, din_p), cmap((0, 0))),     # feat (resident, f32)
                pl.BlockSpec((np_, 1), cmap((0, 0))),         # src (out-deg) norm
                pl.BlockSpec((np_, 1), cmap((0, 0))),         # dst (in-deg) norm
                pl.BlockSpec((din_p, dout_p), cmap((0, 0))),  # W_fc^T  (bf16, resident)
                pl.BlockSpec((din_p, dout_p), cmap((0, 0))),  # W_res^T (bf16, resident)
                pl.BlockSpec((1, dout_p), cmap((0, 0))),      # b_fc
                pl.BlockSpec((1, dout_p), cmap((0, 0))),      # LayerNorm weight
                pl.BlockSpec((1, dout_p), cmap((0, 0))),      # LayerNorm bias
                pl.BlockSpec((1, dout_p), cmap((0, 0))),      # real-column mask
            ],
            out_specs=pl.BlockSpec((tile_i, dout_p), lambda i, k, cnt, kid: (i, 0)),
            scratch_shapes=[pltpu.VMEM((tile_i, din_p), jnp.float32)],
        ),
        compiler_params=pltpu.CompilerParams(
            dimension_semantics=("parallel", "arbitrary"),
            vmem_limit_bytes=vmem_limit),
        cost_estimate=cost,
    )(graph["kcnt"], graph["kidx"],
      graph["adj"], feat_p, graph["src_norm"], graph["dst_norm"],
      wfc_t, wres_t, bfc, lnw, lnb, col_mask)

    return out_p[:n, :dout]


def _reference(adj, feat, w_fc, b_fc, w_res, ln_w, ln_b):
    """Pure-JAX f32 reference matching the PyTorch module."""
    out_deg = jnp.maximum(jnp.sum(adj, axis=0), 1.0)
    in_deg = jnp.maximum(jnp.sum(adj, axis=1), 1.0)
    h = feat * (out_deg ** -0.5)[:, None]
    agg = adj @ h
    rst = (agg @ w_fc.T + b_fc) * (in_deg ** -0.5)[:, None]
    z = rst + feat @ w_res.T
    mean = jnp.mean(z, axis=-1, keepdims=True)
    var = jnp.mean((z - mean) ** 2, axis=-1, keepdims=True)
    z = (z - mean) * jax.lax.rsqrt(var + LN_EPS) * ln_w + ln_b
    return jnp.maximum(z, 0.0)


if __name__ == "__main__":
    key = jax.random.PRNGKey(0)
    N, IN_DIM, OUT_DIM = 8, 16, 32

    k_feat, k_adj, k_wfc, k_bfc, k_wres = jax.random.split(key, 5)

    # node features
    feat = jax.random.normal(k_feat, (N, IN_DIM), dtype=jnp.float32)

    # deterministic random directed graph (dense adjacency, adj[dst, src])
    adj = (jax.random.uniform(k_adj, (N, N)) < 0.4).astype(jnp.float32)

    # nn.Linear-style deterministic init: U(-1/sqrt(in_dim), 1/sqrt(in_dim))
    bound = 1.0 / (IN_DIM ** 0.5)
    w_fc = jax.random.uniform(k_wfc, (OUT_DIM, IN_DIM), minval=-bound, maxval=bound)
    b_fc = jax.random.uniform(k_bfc, (OUT_DIM,), minval=-bound, maxval=bound)
    w_res = jax.random.uniform(k_wres, (OUT_DIM, IN_DIM), minval=-bound, maxval=bound)

    # LayerNorm(out_dim) default affine params
    ln_w = jnp.ones((OUT_DIM,), jnp.float32)
    ln_b = jnp.zeros((OUT_DIM,), jnp.float32)

    # graph preprocessing is hoisted / cacheable across layers & steps
    graph = prepare_graph(adj)
    out = graphconv_forward(graph, feat, w_fc, b_fc, w_res, ln_w, ln_b)
    jax.block_until_ready(out)

    assert out.shape == (N, OUT_DIM)
    assert bool(jnp.all(jnp.isfinite(out)))
    ref = _reference(adj, feat, w_fc, b_fc, w_res, ln_w, ln_b)
    np.testing.assert_allclose(np.asarray(out), np.asarray(ref), atol=5e-2, rtol=5e-2)
    print("KERNEL_OK")
</pallas_src>

<mosaic_0001>
module attributes {stable_mosaic.version = 11 : i64} {
  func.func @kernel(%arg0: i32, %arg1: i32, %arg2: memref<1xi32, #tpu.memory_space<smem>>, %arg3: memref<1x1xi32, #tpu.memory_space<smem>>, %arg4: memref<128x128xbf16, #tpu.memory_space<vmem>>, %arg5: memref<128x128xf32, #tpu.memory_space<vmem>>, %arg6: memref<128x1xf32, #tpu.memory_space<vmem>>, %arg7: memref<128x1xf32, #tpu.memory_space<vmem>>, %arg8: memref<128x128xbf16, #tpu.memory_space<vmem>>, %arg9: memref<128x128xbf16, #tpu.memory_space<vmem>>, %arg10: memref<1x128xf32, #tpu.memory_space<vmem>>, %arg11: memref<1x128xf32, #tpu.memory_space<vmem>>, %arg12: memref<1x128xf32, #tpu.memory_space<vmem>>, %arg13: memref<1x128xf32, #tpu.memory_space<vmem>>, %arg14: memref<128x128xf32, #tpu.memory_space<vmem>>, %arg15: memref<128x128xf32, #tpu.memory_space<vmem>>) attributes {dimension_semantics = [#tpu.dimension_semantics<parallel>, #tpu.dimension_semantics<arbitrary>], iteration_bounds = array<i64: 1, 1>, scalar_prefetch = 2 : i64, scratch_operands = 1 : i64, tpu.core_type = #tpu.core_type<tc>, window_params = [{transform_indices = @transform_0, window_bounds = array<i64: 128, 128>}, {pipeline_mode = #tpu.pipeline_mode<synchronous>, transform_indices = @transform_1, window_bounds = array<i64: 128, 128>}, {pipeline_mode = #tpu.pipeline_mode<synchronous>, transform_indices = @transform_2, window_bounds = array<i64: 128, 1>}, {pipeline_mode = #tpu.pipeline_mode<synchronous>, transform_indices = @transform_3, window_bounds = array<i64: 128, 1>}, {pipeline_mode = #tpu.pipeline_mode<synchronous>, transform_indices = @transform_4, window_bounds = array<i64: 128, 128>}, {pipeline_mode = #tpu.pipeline_mode<synchronous>, transform_indices = @transform_5, window_bounds = array<i64: 128, 128>}, {pipeline_mode = #tpu.pipeline_mode<synchronous>, transform_indices = @transform_6, window_bounds = array<i64: 1, 128>}, {pipeline_mode = #tpu.pipeline_mode<synchronous>, transform_indices = @transform_7, window_bounds = array<i64: 1, 128>}, {pipeline_mode = #tpu.pipeline_mode<synchronous>, transform_indices = @transform_8, window_bounds = array<i64: 1, 128>}, {pipeline_mode = #tpu.pipeline_mode<synchronous>, transform_indices = @transform_9, window_bounds = array<i64: 1, 128>}, {transform_indices = @transform_10, window_bounds = array<i64: 128, 128>}]} {
    %c0_i32 = arith.constant 0 : i32
    %0 = arith.cmpi eq, %arg1, %c0_i32 : i32
    %1 = arith.extui %0 : i1 to i32
    %c0_i32_0 = arith.constant 0 : i32
    %2 = arith.cmpi ne, %1, %c0_i32_0 : i32
    scf.if %2 {
      %cst = arith.constant 0.000000e+00 : f32
      %11 = vector.broadcast %cst : f32 to vector<128x128xf32>
      %c0 = arith.constant 0 : index
      %c0_4 = arith.constant 0 : index
      %12 = vector.load %arg15[%c0, %c0_4] : memref<128x128xf32, #tpu.memory_space<vmem>>, vector<128x128xf32>
      tpu.vector_store %arg15[%c0, %c0_4], %11 {strides = array<i32>} : memref<128x128xf32, #tpu.memory_space<vmem>>, vector<128x128xf32>,
    } else {
    }
    %3 = arith.index_cast %arg0 : i32 to index
    %4 = memref.load %arg2[%3] : memref<1xi32, #tpu.memory_space<smem>>
    %5 = arith.cmpi slt, %arg1, %4 : i32
    %6 = arith.extui %5 : i1 to i32
    %c0_i32_1 = arith.constant 0 : i32
    %7 = arith.cmpi ne, %6, %c0_i32_1 : i32
    scf.if %7 {
      %11 = arith.index_cast %arg0 : i32 to index
      %12 = arith.index_cast %arg1 : i32 to index
      %13 = memref.load %arg3[%11, %12] : memref<1x1xi32, #tpu.memory_space<smem>>
      %c128_i32 = arith.constant 128 : i32
      %14 = arith.muli %13, %c128_i32 : i32
      %15 = tpu.assume_multiple %14, 128 : i32
      %16 = arith.index_cast %15 : i32 to index
      %c0 = arith.constant 0 : index
      %17 = vector.load %arg5[%16, %c0] : memref<128x128xf32, #tpu.memory_space<vmem>>, vector<128x128xf32>
      %18 = arith.index_cast %15 : i32 to index
      %c0_4 = arith.constant 0 : index
      %19 = vector.load %arg6[%18, %c0_4] : memref<128x1xf32, #tpu.memory_space<vmem>>, vector<128x1xf32>
      %20 = vector.broadcast %19 : vector<128x1xf32> to vector<128x128xf32>
      %21 = arith.mulf %17, %20 : vector<128x128xf32>
      %22 = arith.truncf %21 : vector<128x128xf32> to vector<128x128xbf16>
      %c0_5 = arith.constant 0 : index
      %c0_6 = arith.constant 0 : index
      %23 = vector.load %arg15[%c0_5, %c0_6] : memref<128x128xf32, #tpu.memory_space<vmem>>, vector<128x128xf32>
      %c0_7 = arith.constant 0 : index
      %c0_8 = arith.constant 0 : index
      %24 = vector.load %arg4[%c0_7, %c0_8] : memref<128x128xbf16, #tpu.memory_space<vmem>>, vector<128x128xbf16>
      %cst = arith.constant dense<0.000000e+00> : vector<128x128xf32>
      %25 = tpu.matmul %24, %22, %cst {dimension_numbers = #tpu.dot_dimension_numbers<[1], [0], [0], [1], [0, 0, 1, 1], [], []>} : vector<128x128xbf16>, vector<128x128xbf16>, vector<128x128xf32> -> vector<128x128xf32>
      %26 = arith.addf %23, %25 : vector<128x128xf32>
      %c0_9 = arith.constant 0 : index
      %c0_10 = arith.constant 0 : index
      %27 = vector.load %arg15[%c0_9, %c0_10] : memref<128x128xf32, #tpu.memory_space<vmem>>, vector<128x128xf32>
      tpu.vector_store %arg15[%c0_9, %c0_10], %26 {strides = array<i32>} : memref<128x128xf32, #tpu.memory_space<vmem>>, vector<128x128xf32>,
    } else {
    }
    %c0_i32_2 = arith.constant 0 : i32
    %8 = arith.cmpi eq, %arg1, %c0_i32_2 : i32
    %9 = arith.extui %8 : i1 to i32
    %c0_i32_3 = arith.constant 0 : i32
    %10 = arith.cmpi ne, %9, %c0_i32_3 : i32
    scf.if %10 {
      %c128_i32 = arith.constant 128 : i32
      %11 = arith.muli %arg0, %c128_i32 : i32
      %12 = tpu.assume_multiple %11, 128 : i32
      %13 = arith.index_cast %12 : i32 to index
      %c0 = arith.constant 0 : index
      %14 = vector.load %arg7[%13, %c0] : memref<128x1xf32, #tpu.memory_space<vmem>>, vector<128x1xf32>
      %15 = arith.index_cast %12 : i32 to index
      %c0_4 = arith.constant 0 : index
      %16 = vector.load %arg5[%15, %c0_4] : memref<128x128xf32, #tpu.memory_space<vmem>>, vector<128x128xf32>
      %c0_5 = arith.constant 0 : index
      %c0_6 = arith.constant 0 : index
      %17 = vector.load %arg15[%c0_5, %c0_6] : memref<128x128xf32, #tpu.memory_space<vmem>>, vector<128x128xf32>
      %18 = vector.broadcast %14 : vector<128x1xf32> to vector<128x128xf32>
      %19 = arith.mulf %17, %18 : vector<128x128xf32>
      %20 = arith.truncf %19 : vector<128x128xf32> to vector<128x128xbf16>
      %c0_7 = arith.constant 0 : index
      %c0_8 = arith.constant 0 : index
      %21 = vector.load %arg8[%c0_7, %c0_8] : memref<128x128xbf16, #tpu.memory_space<vmem>>, vector<128x128xbf16>
      %cst = arith.constant dense<0.000000e+00> : vector<128x128xf32>
      %22 = tpu.matmul %20, %21, %cst {dimension_numbers = #tpu.dot_dimension_numbers<[1], [0], [0], [1], [0, 0, 1, 1], [], []>} : vector<128x128xbf16>, vector<128x128xbf16>, vector<128x128xf32> -> vector<128x128xf32>
      %23 = arith.truncf %16 : vector<128x128xf32> to vector<128x128xbf16>
      %c0_9 = arith.constant 0 : index
      %c0_10 = arith.constant 0 : index
      %24 = vector.load %arg9[%c0_9, %c0_10] : memref<128x128xbf16, #tpu.memory_space<vmem>>, vector<128x128xbf16>
      %cst_11 = arith.constant dense<0.000000e+00> : vector<128x128xf32>
      %25 = tpu.matmul %23, %24, %cst_11 {dimension_numbers = #tpu.dot_dimension_numbers<[1], [0], [0], [1], [0, 0, 1, 1], [], []>} : vector<128x128xbf16>, vector<128x128xbf16>, vector<128x128xf32> -> vector<128x128xf32>
      %26 = arith.addf %22, %25 : vector<128x128xf32>
      %c0_12 = arith.constant 0 : index
      %c0_13 = arith.constant 0 : index
      %27 = vector.load %arg10[%c0_12, %c0_13] : memref<1x128xf32, #tpu.memory_space<vmem>>, vector<1x128xf32>
      %28 = vector.broadcast %27 : vector<1x128xf32> to vector<128x128xf32>
      %29 = vector.broadcast %14 : vector<128x1xf32> to vector<128x128xf32>
      %30 = arith.mulf %28, %29 : vector<128x128xf32>
      %31 = arith.addf %26, %30 : vector<128x128xf32>
      %c0_14 = arith.constant 0 : index
      %c0_15 = arith.constant 0 : index
      %32 = vector.load %arg13[%c0_14, %c0_15] : memref<1x128xf32, #tpu.memory_space<vmem>>, vector<1x128xf32>
      %33 = vector.broadcast %32 : vector<1x128xf32> to vector<128x128xf32>
      %34 = arith.mulf %31, %33 : vector<128x128xf32>
      %cst_16 = arith.constant dense<0.000000e+00> : vector<128xf32>
      %35 = vector.multi_reduction <add>, %34, %cst_16 [1] : vector<128x128xf32> to vector<128xf32>
      %36 = vector.shape_cast %35 : vector<128xf32> to vector<128x1xf32>
      %cst_17 = arith.constant 3.125000e-02 : f32
      %37 = vector.broadcast %cst_17 : f32 to vector<128x1xf32>
      %38 = arith.mulf %36, %37 : vector<128x1xf32>
      %39 = vector.broadcast %38 : vector<128x1xf32> to vector<128x128xf32>
      %40 = arith.subf %34, %39 : vector<128x128xf32>
      %41 = vector.broadcast %32 : vector<1x128xf32> to vector<128x128xf32>
      %42 = arith.mulf %40, %41 : vector<128x128xf32>
      %43 = arith.mulf %42, %42 : vector<128x128xf32>
      %cst_18 = arith.constant dense<0.000000e+00> : vector<128xf32>
      %44 = vector.multi_reduction <add>, %43, %cst_18 [1] : vector<128x128xf32> to vector<128xf32>
      %45 = vector.shape_cast %44 : vector<128xf32> to vector<128x1xf32>
      %cst_19 = arith.constant 3.125000e-02 : f32
      %46 = vector.broadcast %cst_19 : f32 to vector<128x1xf32>
      %47 = arith.mulf %45, %46 : vector<128x1xf32>
      %cst_20 = arith.constant 9.99999974E-6 : f32
      %48 = vector.broadcast %cst_20 : f32 to vector<128x1xf32>
      %49 = arith.addf %47, %48 : vector<128x1xf32>
      %50 = math.rsqrt %49 : vector<128x1xf32>
      %51 = vector.broadcast %50 : vector<128x1xf32> to vector<128x128xf32>
      %52 = arith.mulf %42, %51 : vector<128x128xf32>
      %c0_21 = arith.constant 0 : index
      %c0_22 = arith.constant 0 : index
      %53 = vector.load %arg11[%c0_21, %c0_22] : memref<1x128xf32, #tpu.memory_space<vmem>>, vector<1x128xf32>
      %54 = vector.broadcast %53 : vector<1x128xf32> to vector<128x128xf32>
      %55 = arith.mulf %52, %54 : vector<128x128xf32>
      %c0_23 = arith.constant 0 : index
      %c0_24 = arith.constant 0 : index
      %56 = vector.load %arg12[%c0_23, %c0_24] : memref<1x128xf32, #tpu.memory_space<vmem>>, vector<1x128xf32>
      %57 = vector.broadcast %56 : vector<1x128xf32> to vector<128x128xf32>
      %58 = arith.addf %55, %57 : vector<128x128xf32>
      %cst_25 = arith.constant 0.000000e+00 : f32
      %59 = vector.broadcast %cst_25 : f32 to vector<128x128xf32>
      %60 = arith.maximumf %58, %59 : vector<128x128xf32>
      %c0_26 = arith.constant 0 : index
      %c0_27 = arith.constant 0 : index
      %61 = vector.load %arg14[%c0_26, %c0_27] : memref<128x128xf32, #tpu.memory_space<vmem>>, vector<128x128xf32>
      tpu.vector_store %arg14[%c0_26, %c0_27], %60 {strides = array<i32>} : memref<128x128xf32, #tpu.memory_space<vmem>>, vector<128x128xf32>,
    } else {
    }
    return
  }
  func.func @transform_0(%arg0: i32, %arg1: i32, %arg2: memref<1xi32, #tpu.memory_space<smem>>, %arg3: memref<1x1xi32, #tpu.memory_space<smem>>) -> (i32, i32) {
    %0 = arith.index_cast %arg0 : i32 to index
    %1 = arith.index_cast %arg1 : i32 to index
    %2 = memref.load %arg3[%0, %1] : memref<1x1xi32, #tpu.memory_space<smem>>
    %c0_i32 = arith.constant 0 : i32
    return %arg0, %2 : i32, i32
  }
  func.func @transform_1(%arg0: i32, %arg1: i32, %arg2: memref<1xi32, #tpu.memory_space<smem>>, %arg3: memref<1x1xi32, #tpu.memory_space<smem>>) -> (i32, i32) {
    %c0_i32 = arith.constant 0 : i32
    %c0_i32_0 = arith.constant 0 : i32
    %c0_i32_1 = arith.constant 0 : i32
    return %c0_i32, %c0_i32_0 : i32, i32
  }
  func.func @transform_2(%arg0: i32, %arg1: i32, %arg2: memref<1xi32, #tpu.memory_space<smem>>, %arg3: memref<1x1xi32, #tpu.memory_space<smem>>) -> (i32, i32) {
    %c0_i32 = arith.constant 0 : i32
    %c0_i32_0 = arith.constant 0 : i32
    %c0_i32_1 = arith.constant 0 : i32
    return %c0_i32, %c0_i32_0 : i32, i32
  }
  func.func @transform_3(%arg0: i32, %arg1: i32, %arg2: memref<1xi32, #tpu.memory_space<smem>>, %arg3: memref<1x1xi32, #tpu.memory_space<smem>>) -> (i32, i32) {
    %c0_i32 = arith.constant 0 : i32
    %c0_i32_0 = arith.constant 0 : i32
    %c0_i32_1 = arith.constant 0 : i32
    return %c0_i32, %c0_i32_0 : i32, i32
  }
  func.func @transform_4(%arg0: i32, %arg1: i32, %arg2: memref<1xi32, #tpu.memory_space<smem>>, %arg3: memref<1x1xi32, #tpu.memory_space<smem>>) -> (i32, i32) {
    %c0_i32 = arith.constant 0 : i32
    %c0_i32_0 = arith.constant 0 : i32
    %c0_i32_1 = arith.constant 0 : i32
    return %c0_i32, %c0_i32_0 : i32, i32
  }
  func.func @transform_5(%arg0: i32, %arg1: i32, %arg2: memref<1xi32, #tpu.memory_space<smem>>, %arg3: memref<1x1xi32, #tpu.memory_space<smem>>) -> (i32, i32) {
    %c0_i32 = arith.constant 0 : i32
    %c0_i32_0 = arith.constant 0 : i32
    %c0_i32_1 = arith.constant 0 : i32
    return %c0_i32, %c0_i32_0 : i32, i32
  }
  func.func @transform_6(%arg0: i32, %arg1: i32, %arg2: memref<1xi32, #tpu.memory_space<smem>>, %arg3: memref<1x1xi32, #tpu.memory_space<smem>>) -> (i32, i32) {
    %c0_i32 = arith.constant 0 : i32
    %c0_i32_0 = arith.constant 0 : i32
    %c0_i32_1 = arith.constant 0 : i32
    return %c0_i32, %c0_i32_0 : i32, i32
  }
  func.func @transform_7(%arg0: i32, %arg1: i32, %arg2: memref<1xi32, #tpu.memory_space<smem>>, %arg3: memref<1x1xi32, #tpu.memory_space<smem>>) -> (i32, i32) {
    %c0_i32 = arith.constant 0 : i32
    %c0_i32_0 = arith.constant 0 : i32
    %c0_i32_1 = arith.constant 0 : i32
    return %c0_i32, %c0_i32_0 : i32, i32
  }
  func.func @transform_8(%arg0: i32, %arg1: i32, %arg2: memref<1xi32, #tpu.memory_space<smem>>, %arg3: memref<1x1xi32, #tpu.memory_space<smem>>) -> (i32, i32) {
    %c0_i32 = arith.constant 0 : i32
    %c0_i32_0 = arith.constant 0 : i32
    %c0_i32_1 = arith.constant 0 : i32
    return %c0_i32, %c0_i32_0 : i32, i32
  }
  func.func @transform_9(%arg0: i32, %arg1: i32, %arg2: memref<1xi32, #tpu.memory_space<smem>>, %arg3: memref<1x1xi32, #tpu.memory_space<smem>>) -> (i32, i32) {
    %c0_i32 = arith.constant 0 : i32
    %c0_i32_0 = arith.constant 0 : i32
    %c0_i32_1 = arith.constant 0 : i32
    return %c0_i32, %c0_i32_0 : i32, i32
  }
  func.func @transform_10(%arg0: i32, %arg1: i32, %arg2: memref<1xi32, #tpu.memory_space<smem>>, %arg3: memref<1x1xi32, #tpu.memory_space<smem>>) -> (i32, i32) {
    %c0_i32 = arith.constant 0 : i32
    %c0_i32_0 = arith.constant 0 : i32
    return %arg0, %c0_i32 : i32, i32
  }
}

</mosaic_0001>

<bundles_post_ra>
// kernel: tpu_custom_call.1
= control target key start
LH: loop header
LB: loop body
LE: loop exit
PB: predicated region body
PF: predicated region fallthrough
CT: control target
= control target key end

     0   :  { %s2227_s0 = inlined_call_operand.<no memory space> [shape: s32[1], index: 0, kind: input, shape index: {}]   ;;  %s2228_s1 = inlined_call_operand.<no memory space> [shape: s32[1,1], index: 1, kind: input, shape index: {}]   ;;  %s2229_s2 = inlined_call_operand.vmem [shape: bf16[128,128], index: 2, kind: input, shape index: {}]   ;;  %s2230_s3 = inlined_call_operand.vmem [shape: f32[128,128], index: 3, kind: input, shape index: {}]   ;;  %s2231_s4 = inlined_call_operand.vmem [shape: f32[128,1], index: 4, kind: input, shape index: {}]   ;;  %s2232_s5 = inlined_call_operand.vmem [shape: f32[128,1], index: 5, kind: input, shape index: {}]   ;;  %s2233_s6 = inlined_call_operand.vmem [shape: bf16[128,128], index: 6, kind: input, shape index: {}]   ;;  %s2234_s7 = inlined_call_operand.hbm [shape: bf16[128,128], index: 7, kind: input, shape index: {}]   ;;  %s2235_s8 = inlined_call_operand.vmem [shape: f32[1,128], index: 8, kind: input, shape index: {}]   ;;  %s2236_s9 = inlined_call_operand.vmem [shape: f32[1,128], index: 9, kind: input, shape index: {}]   ;;  %s2237_s10 = inlined_call_operand.vmem [shape: f32[1,128], index: 10, kind: input, shape index: {}]   ;;  %s2238_s11 = inlined_call_operand.vmem [shape: f32[1,128], index: 11, kind: input, shape index: {}]   ;;  %s2239_s12 = inlined_call_operand.hbm [shape: f32[128,128], index: 12, kind: output, shape index: {}]  }
   0x1   :  { %18 = sst [smem:[#allocation5]] %s2228_s1 }
   0x2   :  { %19 = vsyncpa [#allocation7], 0 }
   0x3   :  { %20 = vsyncpa [#allocation8], 0  ;;  %s1636_s23 = smov [#allocation6]   ;;  %s1588_s27 = scalar_lea.hbm %s2234_s7, 1024 }
   0x4   :  { %s48_s24 = sshll.u32 %s1636_s23, 4  ;;  %p1589_p0 = scmp.ne.s32.totalorder %s2234_s7, %s1588_s27  ;;  %s49_s24 = int_to_ptr.vmem [resolvable:$true] %s48_s24 }
   0x5   :  { %p1592_p1 = scmp.lt.u32.totalorder %s1588_s27, %s2234_s7 }
   0x7   :  { %p1594_p2 = pnand %p1592_p1, %p1589_p0 }
   0x9   :  { %1597 = shalt.err (!%p1594_p2)
}
   0xa   :  { %s1598_s1 = scalar_lea.vmem %s49_s24, 1024  ;;  %p1603_p4 = scmp.lt.s32.totalorder %s49_s24, %s49_s24 }
   0xb   :  { %p1599_p3 = scmp.ne.s32.totalorder %s49_s24, %s1598_s1  ;;  %p1604_p5 = scmp.lt.s32.totalorder %s1598_s1, %s1598_s1 }
   0xd   :  { %p1605_p6 = por %p1604_p5, %p1603_p4 }
   0xf   :  { %p1606_p7 = pnand %p1605_p6, %p1599_p3 }
  0x11   :  { %1609 = shalt.err (!%p1606_p7)
}
  0x12   :  { %s1637_s14 = smov 64   ;;  %s1638_s15 = smov 4  }
  0x13   :  { %54 = dma.hbm_to_vmem [thread:$0]  %s2234_s7, 1024, %s49_s24, [#allocation7], %s1637_s14, %s1637_s14, %s1638_s15  }
  0x14   :  { %1632 = dma.done.wait [#allocation7], 1024  }
  0x15   :  { %1633 = vsyncadd [#allocation7], 4294966272  ;;  %s77_s18 = sld [smem:[#allocation5]]  ;;  %v1639_v0 = vmov 0.0   ;;  %p1313_p9 = scmp.le.s32.totalorder %s2227_s0, 0 }
  0x16   :  { %91 = vst [vmem:[#allocation2] sm:$0xff] %v1639_v0  ;;  %92 = vst [vmem:[#allocation2 + $0x8] sm:$0xff] %v1639_v0  ;;  %s1733_s24 = sld [smem:[#allocation5]] (!%p1313_p9)  ;;  %v1640_v1 = vmov (!%p1313_p9), 0  }
  0x17   :  { %93 = vst [vmem:[#allocation2 + $0x10] sm:$0xff] %v1639_v0  ;;  %94 = vst [vmem:[#allocation2 + $0x18] sm:$0xff] %v1639_v0  ;;  %1529 = vset.pattern.permute.xlu1 (!%p1313_p9), %v1640_v1  ;;  %1528 = vset.pattern.permute.xlu0 (!%p1313_p9), %v1640_v1 }
  0x18   :  { %95 = vst [vmem:[#allocation2 + $0x20] sm:$0xff] %v1639_v0  ;;  %96 = vst [vmem:[#allocation2 + $0x28] sm:$0xff] %v1639_v0 }
  0x19   :  { %97 = vst [vmem:[#allocation2 + $0x30] sm:$0xff] %v1639_v0  ;;  %98 = vst [vmem:[#allocation2 + $0x38] sm:$0xff] %v1639_v0  ;;  %111 = sbr.rel (%p1313_p9) target bundleno = 425 (0x1a9), region = 53 }
  0x1a   :  { %99 = vst [vmem:[#allocation2 + $0x40] sm:$0xff] %v1639_v0  ;;  %100 = vst [vmem:[#allocation2 + $0x48] sm:$0xff] %v1639_v0 }
  0x1b   :  { %101 = vst [vmem:[#allocation2 + $0x50] sm:$0xff] %v1639_v0  ;;  %102 = vst [vmem:[#allocation2 + $0x58] sm:$0xff] %v1639_v0  ;;  %p78_p8 = scmp.lt.s32.totalorder %s77_s18, 0 }
  0x1c   :  { %103 = vst [vmem:[#allocation2 + $0x60] sm:$0xff] %v1639_v0  ;;  %104 = vst [vmem:[#allocation2 + $0x68] sm:$0xff] %v1639_v0  ;;  %s1314_s25 = sshll.u32 (!%p1313_p9), %s1733_s24, 7 }
  0x1d   :  { %105 = vst [vmem:[#allocation2 + $0x70] sm:$0xff] %v1639_v0  ;;  %106 = vst [vmem:[#allocation2 + $0x78] sm:$0xff] %v1639_v0  ;;  %s2241_s18 = smov (!%p78_p8, %s77_s18), 0  ;;  %s134_s28 = scalar_lea.vmem (!%p1313_p9), %s2231_s4, %s1314_s25 }
  0x1e   :  { %s1311_s7 = sshll.u32 %s2241_s18, 2  ;;  %v137_v2 = vld [vmem:[%s134_s28 + $0x10] sm:$0xff] (!%p1313_p9)  ;;  %v135_v3 = vld [vmem:[%s134_s28] sm:$0xff] (!%p1313_p9)  ;;  %v138_v4 = vld [vmem:[%s134_s28 + $0x18] sm:$0xff] (!%p1313_p9)  ;;  %s1748_s4 = scalar_lea.vmem (!%p1313_p9), %s2230_s3, %s1314_s25 }
  0x1f   :  { %s1728_s21 = scalar_lea.vmem %s2229_s2, %s1311_s7  ;;  %163 = vperm.xlu1 (!%p1313_p9), %1529, %v137_v2   ;;  %153 = vperm.xlu0 (!%p1313_p9), %1528, %v135_v3   ;;  %v136_v5 = vld [vmem:[%s134_s28 + $0x8] sm:$0xff] (!%p1313_p9)  ;;  %v139_v7 = vld [vmem:[%s134_s28 + $0x20] sm:$0xff] (!%p1313_p9)  ;;  %v142_v8 = vld [vmem:[%s134_s28 + $0x38] sm:$0xff] (!%p1313_p9) }
  0x20   :  { %v140_v6 = vld [vmem:[%s134_s28 + $0x28] sm:$0xff]  ;;  %v141_v9 = vld [vmem:[%s134_s28 + $0x30] sm:$0xff]  ;;  %v143_v11 = vld [vmem:[%s134_s28 + $0x40] sm:$0xff] }
  0x21   :  { %v144_v10 = vld [vmem:[%s134_s28 + $0x48] sm:$0xff]  ;;  %v146_v12 = vld [vmem:[%s134_s28 + $0x58] sm:$0xff]  ;;  %v145_v13 = vld [vmem:[%s134_s28 + $0x50] sm:$0xff] }
  0x22   :  { %v148_v14 = vld [vmem:[%s134_s28 + $0x68] sm:$0xff]  ;;  %v147_v15 = vld [vmem:[%s134_s28 + $0x60] sm:$0xff]  ;;  %v150_v16 = vld [vmem:[%s134_s28 + $0x78] sm:$0xff] }
  0x23   :  { %168 = vperm.xlu1 %1529, %v138_v4   ;;  %158 = vperm.xlu0 %1528, %v136_v5   ;;  %v149_v17 = vld [vmem:[%s134_s28 + $0x70] sm:$0xff]  ;;  %v1530_v18 = vld [vmem:[%s1728_s21] sm:$0xff]   ;;  %v121_v24 = vld [vmem:[%s1748_s4 + $0x18] sm:$0xff] }
  0x24   :  { %v1531_v19 = vld [vmem:[%s1728_s21 + $0x20] sm:$0xff]   ;;  %1407 = vmatprep.mubr.bf16.mxu0 %v1530_v18  ;;  %v120_v22 = vld [vmem:[%s1748_s4 + $0x10] sm:$0xff]  ;;  %v119_v25 = vld [vmem:[%s1748_s4 + $0x8] sm:$0xff] }
  0x25   :  { %1415 = vmatprep.mubr.bf16.mxu1 %v1531_v19  ;;  %v118_v23 = vld [vmem:[%s1748_s4] sm:$0xff]  ;;  %v123_v32 = vld [vmem:[%s1748_s4 + $0x28] sm:$0xff]  ;;  %v125_v40 = vld [vmem:[%s1748_s4 + $0x38] sm:$0xff] }
  0x26   :  { %v122_v33 = vld [vmem:[%s1748_s4 + $0x20] sm:$0xff]  ;;  %v124_v41 = vld [vmem:[%s1748_s4 + $0x30] sm:$0xff]  ;;  %v127_v47 = vld [vmem:[%s1748_s4 + $0x48] sm:$0xff] }
  0x27   :  { %178 = vperm.xlu1 %1529, %v140_v6   ;;  %173 = vperm.xlu0 %1528, %v139_v7   ;;  %v126_v48 = vld [vmem:[%s1748_s4 + $0x40] sm:$0xff]  ;;  %v129_v54 = vld [vmem:[%s1748_s4 + $0x58] sm:$0xff]  ;;  %v128_v55 = vld [vmem:[%s1748_s4 + $0x50] sm:$0xff] }
  0x28   :  { %v131_v61 = vld [vmem:[%s1748_s4 + $0x68] sm:$0xff]  ;;  %v130_v62 = vld [vmem:[%s1748_s4 + $0x60] sm:$0xff]  ;;  %v133_v4 = vld [vmem:[%s1748_s4 + $0x78] sm:$0xff] }
  0x29   :  { %v132_v5 = vld [vmem:[%s1748_s4 + $0x70] sm:$0xff] }
  0x2a   :  { %v257_v18 = vld [vmem:[#allocation2 + $0x10] sm:$0xff] }
  0x2b   :  { %188 = vperm.xlu1 %1529, %v142_v8   ;;  %183 = vperm.xlu0 %1528, %v141_v9   ;;  %v265_v19 = vld [vmem:[#allocation2 + $0x50] sm:$0xff] }
  0x2f   :  { %198 = vperm.xlu1 %1529, %v144_v10   ;;  %193 = vperm.xlu0 %1528, %v143_v11  }
  0x33   :  { %208 = vperm.xlu1 %1529, %v146_v12   ;;  %203 = vperm.xlu0 %1528, %v145_v13   ;;  %v1532_v12 = vld [vmem:[%s1728_s21 + $0x8] sm:$0xff]  }
  0x34   :  { %v1533_v13 = vld [vmem:[%s1728_s21 + $0x28] sm:$0xff]  }
  0x37   :  { %218 = vperm.xlu1 %1529, %v148_v14   ;;  %213 = vperm.xlu0 %1528, %v147_v15   ;;  %v1534_v14 = vld [vmem:[%s1728_s21 + $0x10] sm:$0xff]  }
  0x38   :  { %v1535_v15 = vld [vmem:[%s1728_s21 + $0x30] sm:$0xff]  }
  0x3b   :  { %228 = vperm.xlu1 %1529, %v150_v16   ;;  %223 = vperm.xlu0 %1528, %v149_v17   ;;  %v1536_v16 = vld [vmem:[%s1728_s21 + $0x18] sm:$0xff]  }
  0x3c   :  { %v1537_v17 = vld [vmem:[%s1728_s21 + $0x38] sm:$0xff]  }
  0x9e   :  { %v164_v20 = vpop.permute.xlu1 %163  ;;  %v154_v21 = vpop.permute.xlu0 %153 }
  0x9f   :  { %v233_v28 = vmul.f32 %v164_v20, %v120_v22  ;;  %v231_v29 = vmul.f32 %v154_v21, %v118_v23  ;;  %v255_v20 = vld [vmem:[#allocation2] sm:$0xff] }
  0xa0   :  { %v263_v21 = vld [vmem:[#allocation2 + $0x40] sm:$0xff] }
  0xa2   :  { %v169_v26 = vpop.permute.xlu1 %168  ;;  %v159_v27 = vpop.permute.xlu0 %158 }
  0xa3   :  { %v234_v30 = vmul.f32 %v169_v26, %v121_v24  ;;  %v232_v31 = vmul.f32 %v159_v27, %v119_v25  ;;  %v258_v24 = vld [vmem:[#allocation2 + $0x18] sm:$0xff] }
  0xa4   :  { %v266_v25 = vld [vmem:[#allocation2 + $0x58] sm:$0xff] }
  0xa5   :  { %v247_v34 = vpack.c.bf16 %v232_v31, %v231_v29  ;;  %v248_v37 = vpack.c.bf16 %v234_v30, %v233_v28  ;;  %v256_v30 = vld [vmem:[#allocation2 + $0x8] sm:$0xff] }
  0xa6   :  { %v179_v35 = vpop.permute.xlu1 %178  ;;  %v174_v36 = vpop.permute.xlu0 %173  ;;  %v264_v31 = vld [vmem:[#allocation2 + $0x48] sm:$0xff] }
  0xa7   :  { %v236_v38 = vmul.f32 %v179_v35, %v123_v32  ;;  %v235_v39 = vmul.f32 %v174_v36, %v122_v33  ;;  %1391 = vmatprep.subr.bf16.mxu0 %v247_v34  ;;  %1487 = vmatprep.subr.bf16.mxu1 %v247_v34 }
  0xa8   :  { %1392 = vmatpush3.bf16.msra.mxu0 %v247_v34  ;;  %1495 = vmatpush3.bf16.msra.mxu1 %v247_v34 }
  0xa9   :  { %1393 = vmatprep.subr.bf16.mxu0 %v248_v37  ;;  %1488 = vmatprep.subr.bf16.mxu1 %v248_v37  ;;  %v249_v44 = vpack.c.bf16 %v236_v38, %v235_v39 }
  0xaa   :  { %v189_v42 = vpop.permute.xlu1 %188  ;;  %v184_v43 = vpop.permute.xlu0 %183 }
  0xab   :  { %v238_v45 = vmul.f32 %v189_v42, %v125_v40  ;;  %v237_v46 = vmul.f32 %v184_v43, %v124_v41  ;;  %v261_v42 = vld [vmem:[#allocation2 + $0x30] sm:$0xff] }
  0xac   :  { %1394 = vmatpush3.bf16.msra.mxu0 %v248_v37  ;;  %1496 = vmatpush3.bf16.msra.mxu1 %v248_v37  ;;  %v269_v43 = vld [vmem:[#allocation2 + $0x70] sm:$0xff] }
  0xad   :  { %1395 = vmatprep.subr.bf16.mxu0 %v249_v44  ;;  %1489 = vmatprep.subr.bf16.mxu1 %v249_v44  ;;  %v250_v51 = vpack.c.bf16 %v238_v45, %v237_v46  ;;  %v267_v45 = vld [vmem:[#allocation2 + $0x60] sm:$0xff] }
  0xae   :  { %v199_v49 = vpop.permute.xlu1 %198  ;;  %v194_v50 = vpop.permute.xlu0 %193 }
  0xaf   :  { %v240_v52 = vmul.f32 %v199_v49, %v127_v47  ;;  %v239_v53 = vmul.f32 %v194_v50, %v126_v48  ;;  %v262_v48 = vld [vmem:[#allocation2 + $0x38] sm:$0xff] }
  0xb0   :  { %1396 = vmatpush3.bf16.msra.mxu0 %v249_v44  ;;  %1497 = vmatpush3.bf16.msra.mxu1 %v249_v44  ;;  %v259_v44 = vld [vmem:[#allocation2 + $0x20] sm:$0xff]  ;;  %v270_v49 = vld [vmem:[#allocation2 + $0x78] sm:$0xff] }
  0xb1   :  { %1397 = vmatprep.subr.bf16.mxu0 %v250_v51  ;;  %1490 = vmatprep.subr.bf16.mxu1 %v250_v51  ;;  %v251_v58 = vpack.c.bf16 %v240_v52, %v239_v53 }
  0xb2   :  { %v209_v56 = vpop.permute.xlu1 %208  ;;  %v204_v57 = vpop.permute.xlu0 %203 }
  0xb3   :  { %v242_v59 = vmul.f32 %v209_v56, %v129_v54  ;;  %v241_v60 = vmul.f32 %v204_v57, %v128_v55  ;;  %v260_v54 = vld [vmem:[#allocation2 + $0x28] sm:$0xff] }
  0xb4   :  { %1398 = vmatpush3.bf16.msra.mxu0 %v250_v51  ;;  %1498 = vmatpush3.bf16.msra.mxu1 %v250_v51  ;;  %v268_v55 = vld [vmem:[#allocation2 + $0x68] sm:$0xff] }
  0xb5   :  { %1399 = vmatprep.subr.bf16.mxu0 %v251_v58  ;;  %1491 = vmatprep.subr.bf16.mxu1 %v251_v58  ;;  %v252_v1 = vpack.c.bf16 %v242_v59, %v241_v60 }
  0xb6   :  { %v219_v63 = vpop.permute.xlu1 %218  ;;  %v214_v0 = vpop.permute.xlu0 %213 }
  0xb7   :  { %v244_v2 = vmul.f32 %v219_v63, %v131_v61  ;;  %v243_v3 = vmul.f32 %v214_v0, %v130_v62 }
  0xb8   :  { %1400 = vmatpush3.bf16.msra.mxu0 %v251_v58  ;;  %1499 = vmatpush3.bf16.msra.mxu1 %v251_v58 }
  0xb9   :  { %1401 = vmatprep.subr.bf16.mxu0 %v252_v1  ;;  %1492 = vmatprep.subr.bf16.mxu1 %v252_v1  ;;  %v253_v8 = vpack.c.bf16 %v244_v2, %v243_v3 }
  0xba   :  { %v229_v6 = vpop.permute.xlu1 %228  ;;  %v224_v7 = vpop.permute.xlu0 %223 }
  0xbb   :  { %v246_v9 = vmul.f32 %v229_v6, %v133_v4  ;;  %v245_v10 = vmul.f32 %v224_v7, %v132_v5 }
  0xbc   :  { %1402 = vmatpush3.bf16.msra.mxu0 %v252_v1  ;;  %1500 = vmatpush3.bf16.msra.mxu1 %v252_v1 }
  0xbd   :  { %1403 = vmatprep.subr.bf16.mxu0 %v253_v8  ;;  %1493 = vmatprep.subr.bf16.mxu1 %v253_v8  ;;  %v254_v11 = vpack.c.bf16 %v246_v9, %v245_v10 }
  0xc0   :  { %1404 = vmatpush3.bf16.msra.mxu0 %v253_v8  ;;  %1501 = vmatpush3.bf16.msra.mxu1 %v253_v8 }
  0xc1   :  { %1405 = vmatprep.subr.bf16.mxu0 %v254_v11  ;;  %1494 = vmatprep.subr.bf16.mxu1 %v254_v11 }
  0xc4   :  { %1406 = vmatpush3.bf16.msra.mxu0 %v254_v11  ;;  %1502 = vmatpush3.bf16.msra.mxu1 %v254_v11 }
  0xc7   :  { %1408 = vmatmul.mubr.bf16.vlgmr.msra.gmra.mrb[0].mxu0 %v1532_v12  ;;  %1416 = vmatmul.mubr.bf16.vlgmr.msra.gmra.mrb[0].mxu1 %v1533_v13 }
  0xc8   :  { %1411 = vmatprep.mubr.bf16.mxu0 %v1534_v14  ;;  %1419 = vmatprep.mubr.bf16.mxu1 %v1535_v15 }
  0xcf   :  { %1412 = vmatmul.mubr.bf16.gmra.mrb[4].mxu0 %v1536_v16  ;;  %1420 = vmatmul.mubr.bf16.gmra.mrb[4].mxu1 %v1537_v17 }
 0x19a   :  { %v1409_v22 = vpop.f32.mrb[0].mxu0  ;;  %v1417_v23 = vpop.f32.mrb[0].mxu1 }
 0x19b   :  { %v434_v26 = vadd.f32 %v1409_v22, %v257_v18  ;;  %v442_v27 = vadd.f32 %v1417_v23, %v265_v19  ;;  %v369_v28 = vpop.f32.mrb[1].mxu0  ;;  %v401_v29 = vpop.f32.mrb[1].mxu1 }
 0x19c   :  { %v432_v32 = vadd.f32 %v369_v28, %v255_v20  ;;  %v440_v33 = vadd.f32 %v401_v29, %v263_v21  ;;  %v1410_v34 = vpop.f32.mrb[2].mxu0  ;;  %v1418_v35 = vpop.f32.mrb[2].mxu1 }
 0x19d   :  { %450 = vst [vmem:[#allocation2 + $0x10] sm:$0xff] %v434_v26  ;;  %458 = vst [vmem:[#allocation2 + $0x50] sm:$0xff] %v442_v27  ;;  %v435_v36 = vadd.f32 %v1410_v34, %v258_v24  ;;  %v443_v37 = vadd.f32 %v1418_v35, %v266_v25  ;;  %v372_v38 = vpop.f32.mrb[3].mxu0  ;;  %v404_v39 = vpop.f32.mrb[3].mxu1 }
 0x19e   :  { %448 = vst [vmem:[#allocation2] sm:$0xff] %v432_v32  ;;  %456 = vst [vmem:[#allocation2 + $0x40] sm:$0xff] %v440_v33  ;;  %v433_v40 = vadd.f32 %v372_v38, %v256_v30  ;;  %v441_v41 = vadd.f32 %v404_v39, %v264_v31 }
 0x19f   :  { %451 = vst [vmem:[#allocation2 + $0x18] sm:$0xff] %v435_v36  ;;  %459 = vst [vmem:[#allocation2 + $0x58] sm:$0xff] %v443_v37 }
 0x1a0   :  { %449 = vst [vmem:[#allocation2 + $0x8] sm:$0xff] %v433_v40  ;;  %457 = vst [vmem:[#allocation2 + $0x48] sm:$0xff] %v441_v41 }
 0x1a2   :  { %v1413_v46 = vpop.f32.mrb[4].mxu0  ;;  %v1421_v47 = vpop.f32.mrb[4].mxu1 }
 0x1a3   :  { %v438_v50 = vadd.f32 %v1413_v46, %v261_v42  ;;  %v446_v51 = vadd.f32 %v1421_v47, %v269_v43  ;;  %v385_v52 = vpop.f32.mrb[5].mxu0  ;;  %v417_v53 = vpop.f32.mrb[5].mxu1 }
 0x1a4   :  { %v436_v56 = vadd.f32 %v385_v52, %v259_v44  ;;  %v444_v57 = vadd.f32 %v417_v53, %v267_v45  ;;  %v1414_v58 = vpop.f32.mrb[6].mxu0  ;;  %v1422_v59 = vpop.f32.mrb[6].mxu1 }
 0x1a5   :  { %454 = vst [vmem:[#allocation2 + $0x30] sm:$0xff] %v438_v50  ;;  %462 = vst [vmem:[#allocation2 + $0x70] sm:$0xff] %v446_v51  ;;  %v439_v60 = vadd.f32 %v1414_v58, %v262_v48  ;;  %v447_v61 = vadd.f32 %v1422_v59, %v270_v49  ;;  %v388_v62 = vpop.f32.mrb[7].mxu0  ;;  %v420_v63 = vpop.f32.mrb[7].mxu1 }
 0x1a6   :  { %452 = vst [vmem:[#allocation2 + $0x20] sm:$0xff] %v436_v56  ;;  %460 = vst [vmem:[#allocation2 + $0x60] sm:$0xff] %v444_v57  ;;  %v437_v0 = vadd.f32 %v388_v62, %v260_v54  ;;  %v445_v1 = vadd.f32 %v420_v63, %v268_v55 }
 0x1a7   :  { %455 = vst [vmem:[#allocation2 + $0x38] sm:$0xff] %v439_v60  ;;  %463 = vst [vmem:[#allocation2 + $0x78] sm:$0xff] %v447_v61 }
 0x1a8   :  { %453 = vst [vmem:[#allocation2 + $0x28] sm:$0xff] %v437_v0  ;;  %461 = vst [vmem:[#allocation2 + $0x68] sm:$0xff] %v445_v1 }
 0x1a9 PF:  { %v471_v2 = vld [vmem:[%s2232_s5 + $0x10] sm:$0xff]  ;;  %v469_v3 = vld [vmem:[%s2232_s5] sm:$0xff]  ;;  %v1641_v4 = vmov 0   ;;  %v472_v5 = vld [vmem:[%s2232_s5 + $0x18] sm:$0xff] }
 0x1aa   :  { %1539 = vset.pattern.permute.xlu1 %v1641_v4  ;;  %1538 = vset.pattern.permute.xlu0 %v1641_v4  ;;  %v470_v6 = vld [vmem:[%s2232_s5 + $0x8] sm:$0xff]  ;;  %v473_v8 = vld [vmem:[%s2232_s5 + $0x20] sm:$0xff]  ;;  %v476_v12 = vld [vmem:[%s2232_s5 + $0x38] sm:$0xff] }
 0x1ab   :  { %530 = vperm.xlu1 %1539, %v471_v2   ;;  %520 = vperm.xlu0 %1538, %v469_v3   ;;  %v474_v7 = vld [vmem:[%s2232_s5 + $0x28] sm:$0xff]  ;;  %v1540_v9 = vld [vmem:[#allocation6] sm:$0xff]   ;;  %v475_v14 = vld [vmem:[%s2232_s5 + $0x30] sm:$0xff] }
 0x1ac   :  { %v1541_v10 = vld [vmem:[%s2233_s6] sm:$0xff]   ;;  %1423 = vmatprep.subr.bf16.mxu1 %v1540_v9  ;;  %v1542_v11 = vld [vmem:[#allocation6 + $0x8] sm:$0xff]   ;;  %v1544_v15 = vld [vmem:[#allocation6 + $0x10] sm:$0xff]  }
 0x1ad   :  { %1424 = vmatpush3.bf16.msra.mxu1 %v1540_v9  ;;  %1455 = vmatprep.subr.bf16.mxu0 %v1541_v10  ;;  %v1543_v13 = vld [vmem:[%s2233_s6 + $0x8] sm:$0xff]   ;;  %v1545_v16 = vld [vmem:[%s2233_s6 + $0x10] sm:$0xff]   ;;  %v477_v18 = vld [vmem:[%s2232_s5 + $0x40] sm:$0xff] }
 0x1ae   :  { %1425 = vmatprep.subr.bf16.mxu1 %v1542_v11  ;;  %1456 = vmatpush3.bf16.msra.mxu0 %v1541_v10  ;;  %v478_v17 = vld [vmem:[%s2232_s5 + $0x48] sm:$0xff]  ;;  %v1546_v19 = vld [vmem:[#allocation6 + $0x18] sm:$0xff]   ;;  %v479_v22 = vld [vmem:[%s2232_s5 + $0x50] sm:$0xff] }
 0x1af   :  { %535 = vperm.xlu1 %1539, %v472_v5   ;;  %525 = vperm.xlu0 %1538, %v470_v6   ;;  %v1547_v20 = vld [vmem:[%s2233_s6 + $0x18] sm:$0xff]   ;;  %v1548_v23 = vld [vmem:[#allocation6 + $0x20] sm:$0xff]   ;;  %v482_v25 = vld [vmem:[%s2232_s5 + $0x68] sm:$0xff] }
 0x1b0   :  { %1457 = vmatprep.subr.bf16.mxu0 %v1543_v13  ;;  %v480_v21 = vld [vmem:[%s2232_s5 + $0x58] sm:$0xff]  ;;  %v1549_v24 = vld [vmem:[%s2233_s6 + $0x20] sm:$0xff]   ;;  %v487_v27 = vld [vmem:[%s2230_s3 + $0x8] sm:$0xff] }
 0x1b1   :  { %1426 = vmatpush3.bf16.msra.mxu1 %v1542_v11  ;;  %v486_v26 = vld [vmem:[%s2230_s3] sm:$0xff]  ;;  %v1550_v29 = vld [vmem:[#allocation6 + $0x28] sm:$0xff]   ;;  %v484_v32 = vld [vmem:[%s2232_s5 + $0x78] sm:$0xff] }
 0x1b2   :  { %1427 = vmatprep.subr.bf16.mxu1 %v1544_v15  ;;  %1458 = vmatpush3.bf16.msra.mxu0 %v1543_v13  ;;  %v481_v28 = vld [vmem:[%s2232_s5 + $0x60] sm:$0xff]  ;;  %v638_v30 = vpack.c.bf16 %v487_v27, %v486_v26  ;;  %v1551_v31 = vld [vmem:[%s2233_s6 + $0x28] sm:$0xff]   ;;  %v483_v33 = vld [vmem:[%s2232_s5 + $0x70] sm:$0xff] }
 0x1b3   :  { %545 = vperm.xlu1 %1539, %v474_v7   ;;  %540 = vperm.xlu0 %1538, %v473_v8   ;;  %v1552_v34 = vld [vmem:[#allocation6 + $0x30] sm:$0xff]   ;;  %v1554_v36 = vld [vmem:[#allocation6 + $0x38] sm:$0xff]   ;;  %v490_v40 = vld [vmem:[%s2230_s3 + $0x20] sm:$0xff] }
 0x1b4   :  { %1459 = vmatprep.subr.bf16.mxu0 %v1545_v16  ;;  %1439 = vmatprep.mubr.bf16.mxu1 %v638_v30  ;;  %v1553_v35 = vld [vmem:[%s2233_s6 + $0x30] sm:$0xff]   ;;  %v1555_v37 = vld [vmem:[%s2233_s6 + $0x38] sm:$0xff]   ;;  %v491_v41 = vld [vmem:[%s2230_s3 + $0x28] sm:$0xff] }
 0x1b5   :  { %1428 = vmatpush3.bf16.msra.mxu1 %v1544_v15  ;;  %v488_v38 = vld [vmem:[%s2230_s3 + $0x10] sm:$0xff]  ;;  %v489_v39 = vld [vmem:[%s2230_s3 + $0x18] sm:$0xff]  ;;  %v640_v43 = vpack.c.bf16 %v491_v41, %v490_v40  ;;  %v494_v46 = vld [vmem:[%s2230_s3 + $0x40] sm:$0xff] }
 0x1b6   :  { %1429 = vmatprep.subr.bf16.mxu1 %v1546_v19  ;;  %1460 = vmatpush3.bf16.msra.mxu0 %v1545_v16  ;;  %v639_v42 = vpack.c.bf16 %v489_v39, %v488_v38  ;;  %v492_v44 = vld [vmem:[%s2230_s3 + $0x30] sm:$0xff]  ;;  %v493_v45 = vld [vmem:[%s2230_s3 + $0x38] sm:$0xff]  ;;  %v495_v47 = vld [vmem:[%s2230_s3 + $0x48] sm:$0xff] }
 0x1b7   :  { %555 = vperm.xlu1 %1539, %v476_v12   ;;  %550 = vperm.xlu0 %1538, %v475_v14   ;;  %v641_v48 = vpack.c.bf16 %v493_v45, %v492_v44  ;;  %v642_v49 = vpack.c.bf16 %v495_v47, %v494_v46  ;;  %v496_v50 = vld [vmem:[%s2230_s3 + $0x50] sm:$0xff]  ;;  %v497_v51 = vld [vmem:[%s2230_s3 + $0x58] sm:$0xff]  ;;  %v498_v52 = vld [vmem:[%s2230_s3 + $0x60] sm:$0xff] }
 0x1b8   :  { %1461 = vmatprep.subr.bf16.mxu0 %v1547_v20  ;;  %v499_v53 = vld [vmem:[%s2230_s3 + $0x68] sm:$0xff]  ;;  %v643_v54 = vpack.c.bf16 %v497_v51, %v496_v50  ;;  %v500_v56 = vld [vmem:[%s2230_s3 + $0x70] sm:$0xff]  ;;  %v501_v57 = vld [vmem:[%s2230_s3 + $0x78] sm:$0xff] }
 0x1b9   :  { %1430 = vmatpush3.bf16.msra.mxu1 %v1546_v19  ;;  %v644_v55 = vpack.c.bf16 %v499_v53, %v498_v52  ;;  %v645_v58 = vpack.c.bf16 %v501_v57, %v500_v56  ;;  %v504_v61 = vld [vmem:[#allocation2 + $0x10] sm:$0xff]  ;;  %v502_v62 = vld [vmem:[#allocation2] sm:$0xff]  ;;  %v505_v63 = vld [vmem:[#allocation2 + $0x18] sm:$0xff] }
 0x1ba   :  { %1431 = vmatprep.subr.bf16.mxu1 %v1548_v23  ;;  %1462 = vmatpush3.bf16.msra.mxu0 %v1547_v20  ;;  %v503_v0 = vld [vmem:[#allocation2 + $0x8] sm:$0xff]  ;;  %v506_v8 = vld [vmem:[#allocation2 + $0x20] sm:$0xff]  ;;  %v509_v15 = vld [vmem:[#allocation2 + $0x38] sm:$0xff] }
 0x1bb   :  { %565 = vperm.xlu1 %1539, %v478_v17   ;;  %560 = vperm.xlu0 %1538, %v477_v18   ;;  %v507_v7 = vld [vmem:[#allocation2 + $0x28] sm:$0xff]  ;;  %v508_v16 = vld [vmem:[#allocation2 + $0x30] sm:$0xff] }
 0x1bc   :  { %1463 = vmatprep.subr.bf16.mxu0 %v1549_v24  ;;  %v512_v30 = vld [vmem:[#allocation2 + $0x50] sm:$0xff] }
 0x1bd   :  { %1432 = vmatpush3.bf16.msra.mxu1 %v1548_v23  ;;  %v510_v23 = vld [vmem:[#allocation2 + $0x40] sm:$0xff]  ;;  %v516_v44 = vld [vmem:[#allocation2 + $0x70] sm:$0xff] }
 0x1be   :  { %1433 = vmatprep.subr.bf16.mxu1 %v1550_v29  ;;  %1464 = vmatpush3.bf16.msra.mxu0 %v1549_v24 }
 0x1bf   :  { %575 = vperm.xlu1 %1539, %v480_v21   ;;  %570 = vperm.xlu0 %1538, %v479_v22   ;;  %v511_v22 = vld [vmem:[#allocation2 + $0x48] sm:$0xff] }
 0x1c0   :  { %1465 = vmatprep.subr.bf16.mxu0 %v1551_v31 }
 0x1c1   :  { %1434 = vmatpush3.bf16.msra.mxu1 %v1550_v29  ;;  %v513_v29 = vld [vmem:[#allocation2 + $0x58] sm:$0xff] }
 0x1c2   :  { %1435 = vmatprep.subr.bf16.mxu1 %v1552_v34  ;;  %1466 = vmatpush3.bf16.msra.mxu0 %v1551_v31 }
 0x1c3   :  { %585 = vperm.xlu1 %1539, %v482_v25   ;;  %580 = vperm.xlu0 %1538, %v481_v28  }
 0x1c4   :  { %1467 = vmatprep.subr.bf16.mxu0 %v1553_v35 }
 0x1c5   :  { %1436 = vmatpush3.bf16.msra.mxu1 %v1552_v34 }
 0x1c6   :  { %1437 = vmatprep.subr.bf16.mxu1 %v1554_v36  ;;  %1468 = vmatpush3.bf16.msra.mxu0 %v1553_v35 }
 0x1c7   :  { %595 = vperm.xlu1 %1539, %v484_v32   ;;  %590 = vperm.xlu0 %1538, %v483_v33  }
 0x1c8   :  { %1469 = vmatprep.subr.bf16.mxu0 %v1555_v37 }
 0x1c9   :  { %1438 = vmatpush3.bf16.msra.mxu1 %v1554_v36  ;;  %v515_v36 = vld [vmem:[#allocation2 + $0x68] sm:$0xff] }
 0x1ca   :  { %1470 = vmatpush3.bf16.msra.mxu0 %v1555_v37  ;;  %v514_v37 = vld [vmem:[#allocation2 + $0x60] sm:$0xff] }
 0x1cc   :  { %1440 = vmatmul.mubr.bf16.vlgmr.msra.gmra.mrb[0].mxu1 %v639_v42 }
 0x1cd   :  { %1443 = vmatprep.mubr.bf16.mxu1 %v640_v43  ;;  %v517_v43 = vld [vmem:[#allocation2 + $0x78] sm:$0xff] }
 0x1d4   :  { %1444 = vmatmul.mubr.bf16.gmra.mrb[4].mxu1 %v641_v48 }
 0x1d5   :  { %1447 = vmatprep.mubr.bf16.mxu1 %v642_v49 }
 0x1dc   :  { %1448 = vmatmul.mubr.bf16.gmra.mrb[8].mxu1 %v643_v54 }
 0x1dd   :  { %1451 = vmatprep.mubr.bf16.mxu1 %v644_v55 }
 0x1e4   :  { %1452 = vmatmul.mubr.bf16.gmra.mrb[12].mxu1 %v645_v58 }
 0x22a   :  { %v1892_v59 = vpop.permute.xlu1 %530  ;;  %v1894_v60 = vpop.permute.xlu0 %520 }
 0x22b   :  { %v600_v3 = vmul.f32 %v1892_v59, %v504_v61  ;;  %v598_v4 = vmul.f32 %v1894_v60, %v502_v62 }
 0x22e   :  { %v1896_v1 = vpop.permute.xlu1 %535  ;;  %v1898_v2 = vpop.permute.xlu0 %525 }
 0x22f   :  { %v601_v5 = vmul.f32 %v1896_v1, %v505_v63  ;;  %v599_v6 = vmul.f32 %v1898_v2, %v503_v0 }
 0x231   :  { %v615_v9 = vpack.c.bf16 %v601_v5, %v600_v3  ;;  %v614_v10 = vpack.c.bf16 %v599_v6, %v598_v4 }
 0x232   :  { %v1904_v11 = vpop.permute.xlu1 %545  ;;  %v1906_v12 = vpop.permute.xlu0 %540 }
 0x233   :  { %v603_v13 = vmul.f32 %v1904_v11, %v507_v7  ;;  %v602_v14 = vmul.f32 %v1906_v12, %v506_v8  ;;  %1471 = vmatprep.mubr.bf16.mxu0 %v614_v10  ;;  %v1953_v7 = vld [vmem:[%s2235_s8] ss:$0 sm:$0xff] }
 0x234   :  { %1472 = vmatmul.mubr.bf16.vlgmr.msra.gmra.mrb[0].mxu0 %v615_v9  ;;  %v961_v9 = vmul.f32 %v1953_v7, %v1892_v59  ;;  %v960_v59 = vmul.f32 %v1953_v7, %v1898_v2 }
 0x235   :  { %v616_v17 = vpack.c.bf16 %v603_v13, %v602_v14  ;;  %v959_v14 = vmul.f32 %v1953_v7, %v1894_v60 }
 0x236   :  { %v1910_v18 = vpop.permute.xlu1 %555  ;;  %v1912_v19 = vpop.permute.xlu0 %550 }
 0x237   :  { %v605_v20 = vmul.f32 %v1910_v18, %v509_v15  ;;  %v604_v21 = vmul.f32 %v1912_v19, %v508_v16  ;;  %1475 = vmatprep.mubr.bf16.mxu0 %v616_v17  ;;  %v1962_v17 = vld [vmem:[%s2238_s11] ss:$0 sm:$0xff] }
 0x239   :  { %v617_v24 = vpack.c.bf16 %v605_v20, %v604_v21  ;;  %v962_v20 = vmul.f32 %v1953_v7, %v1896_v1  ;;  %v965_v1 = vmul.f32 %v1953_v7, %v1912_v19 }
 0x23a   :  { %v1916_v25 = vpop.permute.xlu1 %565  ;;  %v1918_v26 = vpop.permute.xlu0 %560 }
 0x23b   :  { %v607_v27 = vmul.f32 %v1916_v25, %v511_v22  ;;  %v606_v28 = vmul.f32 %v1918_v26, %v510_v23 }
 0x23c   :  { %1476 = vmatmul.mubr.bf16.gmra.mrb[4].mxu0 %v617_v24 }
 0x23d   :  { %v618_v31 = vpack.c.bf16 %v607_v27, %v606_v28 }
 0x23e   :  { %v1922_v32 = vpop.permute.xlu1 %575  ;;  %v1924_v33 = vpop.permute.xlu0 %570 }
 0x23f   :  { %v609_v34 = vmul.f32 %v1922_v32, %v513_v29  ;;  %v608_v35 = vmul.f32 %v1924_v33, %v512_v30  ;;  %1479 = vmatprep.mubr.bf16.mxu0 %v618_v31 }
 0x241   :  { %v619_v38 = vpack.c.bf16 %v609_v34, %v608_v35 }
 0x242   :  { %v1928_v39 = vpop.permute.xlu1 %585  ;;  %v1930_v40 = vpop.permute.xlu0 %580 }
 0x243   :  { %v611_v41 = vmul.f32 %v1928_v39, %v515_v36  ;;  %v610_v42 = vmul.f32 %v1930_v40, %v514_v37  ;;  %v963_v36 = vmul.f32 %v1953_v7, %v1906_v12 }
 0x244   :  { %1480 = vmatmul.mubr.bf16.gmra.mrb[8].mxu0 %v619_v38 }
 0x245   :  { %v620_v45 = vpack.c.bf16 %v611_v41, %v610_v42  ;;  %v966_v41 = vmul.f32 %v1953_v7, %v1910_v18 }
 0x246   :  { %v1934_v46 = vpop.permute.xlu1 %595  ;;  %v1936_v47 = vpop.permute.xlu0 %590 }
 0x247   :  { %v613_v48 = vmul.f32 %v1934_v46, %v517_v43  ;;  %v612_v49 = vmul.f32 %v1936_v47, %v516_v44  ;;  %1483 = vmatprep.mubr.bf16.mxu0 %v620_v45  ;;  %v964_v44 = vmul.f32 %v1953_v7, %v1904_v11 }
 0x249   :  { %v621_v50 = vpack.c.bf16 %v613_v48, %v612_v49 }
 0x24c   :  { %1484 = vmatmul.mubr.bf16.gmra.mrb[12].mxu0 %v621_v50 }
 0x29f   :  { %v1441_v51 = vpop.f32.mrb[0].mxu1 }
 0x2a0   :  { %v744_v52 = vpop.f32.mrb[1].mxu1 }
 0x2a1   :  { %v1442_v53 = vpop.f32.mrb[2].mxu1 }
 0x2a2   :  { %v747_v54 = vpop.f32.mrb[3].mxu1 }
 0x2a7   :  { %v1445_v55 = vpop.f32.mrb[4].mxu1 }
 0x2a8   :  { %v760_v56 = vpop.f32.mrb[5].mxu1 }
 0x2a9   :  { %v1446_v57 = vpop.f32.mrb[6].mxu1 }
 0x2aa   :  { %v763_v58 = vpop.f32.mrb[7].mxu1 }
 0x2af   :  { %v1449_v61 = vpop.f32.mrb[8].mxu1 }
 0x2b0   :  { %v776_v62 = vpop.f32.mrb[9].mxu1 }
 0x2b1   :  { %v1450_v63 = vpop.f32.mrb[10].mxu1 }
 0x2b2   :  { %v1940_v0 = vpop.f32.mrb[11].mxu1 }
 0x2b7   :  { %v1942_v3 = vpop.f32.mrb[12].mxu1 }
 0x2b8   :  { %v1944_v4 = vpop.f32.mrb[13].mxu1 }
 0x2b9   :  { %v1946_v5 = vpop.f32.mrb[14].mxu1 }
 0x2ba   :  { %v1948_v6 = vpop.f32.mrb[15].mxu1 }
 0x307   :  { %v1473_v8 = vpop.f32.mrb[0].mxu0 }
 0x308   :  { %v898_v10 = vadd.f32 %v1473_v8, %v1441_v51  ;;  %v889_v13 = vpop.f32.mrb[1].mxu0  ;;  %v970_v8 = vmul.f32 %v1953_v7, %v1922_v32 }
 0x309   :  { %v890_v15 = vadd.f32 %v889_v13, %v744_v52  ;;  %v1474_v16 = vpop.f32.mrb[2].mxu0  ;;  %v969_v52 = vmul.f32 %v1953_v7, %v1924_v33 }
 0x30a   :  { %v977_v21 = vadd.f32 %v961_v9, %v898_v10  ;;  %v901_v22 = vadd.f32 %v1474_v16, %v1442_v53  ;;  %v892_v23 = vpop.f32.mrb[3].mxu0 }
 0x30b   :  { %v975_v24 = vadd.f32 %v959_v14, %v890_v15  ;;  %v893_v27 = vadd.f32 %v892_v23, %v747_v54 }
 0x30c   :  { %v978_v28 = vadd.f32 %v962_v20, %v901_v22  ;;  %v1969_v60 = vmul.f32 %v1962_v17, %v977_v21  ;;  %v971_v21 = vmul.f32 %v1953_v7, %v1930_v40 }
 0x30d   :  { %v976_v29 = vadd.f32 %v960_v59, %v893_v27  ;;  %v1978_v2 = vmul.f32 %v1962_v17, %v975_v24  ;;  %v972_v24 = vmul.f32 %v1953_v7, %v1928_v39  ;;  %v973_v27 = vmul.f32 %v1953_v7, %v1936_v47 }
 0x30e   :  { %1018 = vadd.xlane.f32.xlu0 %v1969_v60  ;;  %v1989_v12 = vmul.f32 %v1962_v17, %v978_v28 }
 0x30f   :  { %v1477_v30 = vpop.f32.mrb[4].mxu0  ;;  %v1973_v31 = vmul.f32 %v1962_v17, %v976_v29 }
 0x310   :  { %v914_v34 = vadd.f32 %v1477_v30, %v1445_v55  ;;  %v905_v35 = vpop.f32.mrb[5].mxu0 }
 0x311   :  { %v906_v37 = vadd.f32 %v905_v35, %v760_v56  ;;  %1016 = vadd.xlane.f32.xlu1 %v1973_v31  ;;  %v1478_v38 = vpop.f32.mrb[6].mxu0  ;;  %v967_v56 = vmul.f32 %v1953_v7, %v1918_v26 }
 0x312   :  { %v981_v42 = vadd.f32 %v965_v1, %v914_v34  ;;  %v917_v43 = vadd.f32 %v1478_v38, %v1446_v57  ;;  %1014 = vadd.xlane.f32.xlu0 %v1978_v2  ;;  %v908_v19 = vpop.f32.mrb[7].mxu0  ;;  %v974_v1 = vmul.f32 %v1953_v7, %v1934_v46 }
 0x313   :  { %v979_v45 = vadd.f32 %v963_v36, %v906_v37  ;;  %v909_v48 = vadd.f32 %v908_v19, %v763_v58 }
 0x314   :  { %v982_v49 = vadd.f32 %v966_v41, %v917_v43  ;;  %v1992_v50 = vmul.f32 %v1962_v17, %v981_v42 }
 0x315   :  { %v980_v51 = vadd.f32 %v964_v44, %v909_v48  ;;  %v2002_v55 = vmul.f32 %v1962_v17, %v979_v45 }
 0x316   :  { %1020 = vadd.xlane.f32.xlu0 %v1989_v12  ;;  %1026 = vadd.xlane.f32.xlu1 %v1992_v50  ;;  %v1999_v54 = vmul.f32 %v1962_v17, %v982_v49 }
 0x317   :  { %v1481_v18 = vpop.f32.mrb[8].mxu0  ;;  %v2014_v26 = vmul.f32 %v1962_v17, %v980_v51 }
 0x318   :  { %v930_v53 = vadd.f32 %v1481_v18, %v1449_v61  ;;  %v921_v11 = vpop.f32.mrb[9].mxu0  ;;  %v968_v61 = vmul.f32 %v1953_v7, %v1916_v25 }
 0x319   :  { %v922_v57 = vadd.f32 %v921_v11, %v776_v62  ;;  %v1482_v58 = vpop.f32.mrb[10].mxu0 }
 0x31a   :  { %v985_v9 = vadd.f32 %v969_v52, %v930_v53  ;;  %v933_v10 = vadd.f32 %v1482_v58, %v1450_v63  ;;  %1028 = vadd.xlane.f32.xlu0 %v1999_v54  ;;  %1022 = vadd.xlane.f32.xlu1 %v2002_v55  ;;  %v924_v33 = vpop.f32.mrb[11].mxu0 }
 0x31b   :  { %v983_v13 = vadd.f32 %v967_v56, %v922_v57  ;;  %v925_v14 = vadd.f32 %v924_v33, %v1940_v0 }
 0x31c   :  { %v986_v15 = vadd.f32 %v970_v8, %v933_v10  ;;  %v2017_v62 = vmul.f32 %v1962_v17, %v985_v9 }
 0x31d   :  { %v984_v32 = vadd.f32 %v968_v61, %v925_v14  ;;  %v2026_v0 = vmul.f32 %v1962_v17, %v983_v13 }
 0x31e   :  { %1024 = vadd.xlane.f32.xlu0 %v2014_v26  ;;  %1034 = vadd.xlane.f32.xlu1 %v2017_v62  ;;  %v2023_v25 = vmul.f32 %v1962_v17, %v986_v15 }
 0x31f   :  { %v1485_v63 = vpop.f32.mrb[12].mxu0  ;;  %v2040_v40 = vmul.f32 %v1962_v17, %v984_v32 }
 0x320   :  { %v946_v16 = vadd.f32 %v1485_v63, %v1942_v3  ;;  %v937_v20 = vpop.f32.mrb[13].mxu0 }
 0x321   :  { %v938_v22 = vadd.f32 %v937_v20, %v1944_v4  ;;  %v1486_v23 = vpop.f32.mrb[14].mxu0 }
 0x322   :  { %v949_v59 = vadd.f32 %v1486_v23, %v1946_v5  ;;  %1036 = vadd.xlane.f32.xlu0 %v2023_v25  ;;  %1030 = vadd.xlane.f32.xlu1 %v2026_v0  ;;  %v940_v3 = vpop.f32.mrb[15].mxu0  ;;  %v989_v4 = vadd.f32 %v973_v27, %v946_v16 }
 0x323   :  { %v987_v28 = vadd.f32 %v971_v21, %v938_v22  ;;  %v941_v29 = vadd.f32 %v940_v3, %v1948_v6 }
 0x324   :  { %v990_v47 = vadd.f32 %v974_v1, %v949_v59  ;;  %v2053_v6 = vmul.f32 %v1962_v17, %v989_v4 }
 0x325   :  { %v988_v30 = vadd.f32 %v972_v24, %v941_v29  ;;  %v2043_v5 = vmul.f32 %v1962_v17, %v987_v28 }
 0x326   :  { %1032 = vadd.xlane.f32.xlu0 %v2040_v40  ;;  %v2058_v34 = vmul.f32 %v1962_v17, %v990_v47 }
 0x327   :  { %1038 = vadd.xlane.f32.xlu1 %v2043_v5  ;;  %v2050_v39 = vmul.f32 %v1962_v17, %v988_v30 }
 0x32a   :  { %1040 = vadd.xlane.f32.xlu0 %v2050_v39 }
 0x32b   :  { %1042 = vadd.xlane.f32.xlu1 %v2053_v6 }
 0x32e   :  { %1044 = vadd.xlane.f32.xlu0 %v2058_v34 }
 0x39b   :  { %v1019_v46 = vpop.xlane.xlu0 %1018 }
 0x39c   :  { %v1048_v7 = vmul.f32 0.03125, %v1019_v46 }
 0x39e   :  { %v1064_v35 = vsub.f32 %v1969_v60, %v1048_v7  ;;  %v1017_v36 = vpop.xlane.xlu1 %1016 }
 0x39f   :  { %v1015_v37 = vpop.xlane.xlu0 %1014  ;;  %v1047_v42 = vmul.f32 0.03125, %v1017_v36 }
 0x3a0   :  { %v1046_v38 = vmul.f32 0.03125, %v1015_v37  ;;  %v2063_v41 = vmul.f32 %v1962_v17, %v1064_v35 }
 0x3a1   :  { %v1063_v60 = vsub.f32 %v1973_v31, %v1047_v42 }
 0x3a2   :  { %v1062_v43 = vsub.f32 %v1978_v2, %v1046_v38  ;;  %v1096_v19 = vmul.f32 %v2063_v41, %v2063_v41 }
 0x3a3   :  { %v1027_v44 = vpop.xlane.xlu1 %1026  ;;  %v1021_v45 = vpop.xlane.xlu0 %1020  ;;  %v2083_v31 = vmul.f32 %v1962_v17, %v1063_v60 }
 0x3a4   :  { %v1052_v48 = vmul.f32 0.03125, %v1027_v44  ;;  %v1049_v49 = vmul.f32 0.03125, %v1021_v45  ;;  %1114 = vadd.xlane.f32.xlu1 %v1096_v19  ;;  %v2069_v51 = vmul.f32 %v1962_v17, %v1062_v43 }
 0x3a5   :  { %v1095_v16 = vmul.f32 %v2083_v31, %v2083_v31 }
 0x3a6   :  { %v1068_v18 = vsub.f32 %v1992_v50, %v1052_v48  ;;  %v1065_v52 = vsub.f32 %v1989_v12, %v1049_v49  ;;  %v1094_v2 = vmul.f32 %v2069_v51, %v2069_v51 }
 0x3a7   :  { %v1023_v53 = vpop.xlane.xlu1 %1022  ;;  %v1029_v11 = vpop.xlane.xlu0 %1028 }
 0x3a8   :  { %v1050_v56 = vmul.f32 0.03125, %v1023_v53  ;;  %v1053_v57 = vmul.f32 0.03125, %v1029_v11  ;;  %1110 = vadd.xlane.f32.xlu1 %v1094_v2  ;;  %v2077_v58 = vmul.f32 %v1962_v17, %v1068_v18  ;;  %v2080_v8 = vmul.f32 %v1962_v17, %v1065_v52 }
 0x3aa   :  { %v1066_v50 = vsub.f32 %v2002_v55, %v1050_v56  ;;  %v1069_v12 = vsub.f32 %v1999_v54, %v1053_v57  ;;  %v1100_v9 = vmul.f32 %v2077_v58, %v2077_v58  ;;  %v1097_v10 = vmul.f32 %v2080_v8, %v2080_v8 }
 0x3ab   :  { %v1035_v33 = vpop.xlane.xlu1 %1034  ;;  %v1025_v61 = vpop.xlane.xlu0 %1024 }
 0x3ac   :  { %v1056_v13 = vmul.f32 0.03125, %v1035_v33  ;;  %v1051_v14 = vmul.f32 0.03125, %v1025_v61  ;;  %1122 = vadd.xlane.f32.xlu1 %v1100_v9  ;;  %1116 = vadd.xlane.f32.xlu0 %v1097_v10  ;;  %v2092_v15 = vmul.f32 %v1962_v17, %v1066_v50  ;;  %v2095_v32 = vmul.f32 %v1962_v17, %v1069_v12 }
 0x3ae   :  { %v1072_v54 = vsub.f32 %v2017_v62, %v1056_v13  ;;  %v1067_v55 = vsub.f32 %v2014_v26, %v1051_v14  ;;  %v1098_v63 = vmul.f32 %v2092_v15, %v2092_v15  ;;  %v1101_v62 = vmul.f32 %v2095_v32, %v2095_v32 }
 0x3af   :  { %v1031_v20 = vpop.xlane.xlu1 %1030  ;;  %v1037_v21 = vpop.xlane.xlu0 %1036 }
 0x3b0   :  { %v1054_v22 = vmul.f32 0.03125, %v1031_v20  ;;  %v1057_v23 = vmul.f32 0.03125, %v1037_v21  ;;  %1118 = vadd.xlane.f32.xlu1 %v1098_v63  ;;  %1112 = vadd.xlane.f32.xlu0 %v1095_v16  ;;  %v2104_v59 = vmul.f32 %v1962_v17, %v1072_v54  ;;  %v2113_v27 = vmul.f32 %v1962_v17, %v1067_v55  ;;  %v2160_v20 = vld [vmem:[%s2236_s9] ss:$0 sm:$0xff]  ;;  %s1642_s9 = smov [#allocation9]  }
 0x3b2   :  { %v1070_v26 = vsub.f32 %v2026_v0, %v1054_v22  ;;  %v1073_v3 = vsub.f32 %v2023_v25, %v1057_v23  ;;  %v1104_v24 = vmul.f32 %v2104_v59, %v2104_v59  ;;  %v1099_v0 = vmul.f32 %v2113_v27, %v2113_v27 }
 0x3b3   :  { %v1033_v28 = vpop.xlane.xlu0 %1032 }
 0x3b4   :  { %v1055_v29 = vmul.f32 0.03125, %v1033_v28  ;;  %v1039_v4 = vpop.xlane.xlu1 %1038  ;;  %1130 = vadd.xlane.f32.xlu1 %v1104_v24  ;;  %1124 = vadd.xlane.f32.xlu0 %v1101_v62  ;;  %v2116_v30 = vmul.f32 %v1962_v17, %v1070_v26  ;;  %v2124_v46 = vmul.f32 %v1962_v17, %v1073_v3  ;;  %v2166_v3 = vld [vmem:[%s2237_s10] ss:$0 sm:$0xff]  ;;  %s1289_s10 = sshll.u32 %s1642_s9, 4  ;;  %s1290_s10 = int_to_ptr.vmem [resolvable:$true] %s1289_s10 }
 0x3b5   :  { %v1058_v1 = vmul.f32 0.03125, %v1039_v4  ;;  %s1610_s6 = scalar_lea.vmem %s1290_s10, 2048  ;;  %p1615_p11 = scmp.lt.s32.totalorder %s1290_s10, %s1290_s10 }
 0x3b6   :  { %v1071_v47 = vsub.f32 %v2040_v40, %v1055_v29  ;;  %v1102_v25 = vmul.f32 %v2116_v30, %v2116_v30  ;;  %v1105_v43 = vmul.f32 %v2124_v46, %v2124_v46  ;;  %p1611_p10 = scmp.ne.s32.totalorder %s1290_s10, %s1610_s6  ;;  %p1616_p12 = scmp.lt.s32.totalorder %s1610_s6, %s1610_s6 }
 0x3b7   :  { %v1074_v7 = vsub.f32 %v2043_v5, %v1058_v1  ;;  %v1041_v35 = vpop.xlane.xlu0 %1040 }
 0x3b8   :  { %v1059_v36 = vmul.f32 0.03125, %v1041_v35  ;;  %v1043_v37 = vpop.xlane.xlu1 %1042  ;;  %1126 = vadd.xlane.f32.xlu1 %v1102_v25  ;;  %1120 = vadd.xlane.f32.xlu0 %v1099_v0  ;;  %v2134_v19 = vmul.f32 %v1962_v17, %v1071_v47  ;;  %p1617_p13 = por %p1616_p12, %p1615_p11 }
 0x3b9   :  { %v1060_v38 = vmul.f32 0.03125, %v1043_v37  ;;  %v2128_v42 = vmul.f32 %v1962_v17, %v1074_v7 }
 0x3ba   :  { %v1075_v40 = vsub.f32 %v2050_v39, %v1059_v36  ;;  %v1103_v60 = vmul.f32 %v2134_v19, %v2134_v19  ;;  %p1618_p0 = pnand %p1617_p13, %p1611_p10 }
 0x3bb   :  { %v1076_v44 = vsub.f32 %v2053_v6, %v1060_v38  ;;  %v1045_v5 = vpop.xlane.xlu0 %1044  ;;  %v1106_v45 = vmul.f32 %v2128_v42, %v2128_v42 }
 0x3bc   :  { %v1061_v48 = vmul.f32 0.03125, %v1045_v5  ;;  %1132 = vadd.xlane.f32.xlu0 %v1105_v43  ;;  %v2146_v18 = vmul.f32 %v1962_v17, %v1075_v40 }
 0x3bd   :  { %1134 = vadd.xlane.f32.xlu1 %v1106_v45  ;;  %v2140_v49 = vmul.f32 %v1962_v17, %v1076_v44 }
 0x3be   :  { %v1077_v39 = vsub.f32 %v2058_v34, %v1061_v48  ;;  %v1107_v52 = vmul.f32 %v2146_v18, %v2146_v18 }
 0x3bf   :  { %v1108_v6 = vmul.f32 %v2140_v49, %v2140_v49 }
 0x3c0   :  { %1128 = vadd.xlane.f32.xlu0 %v1103_v60  ;;  %v2153_v2 = vmul.f32 %v1962_v17, %v1077_v39 }
 0x3c1   :  { %1138 = vadd.xlane.f32.xlu1 %v1108_v6 }
 0x3c2   :  { %v1109_v34 = vmul.f32 %v2153_v2, %v2153_v2 }
 0x3c4   :  { %1136 = vadd.xlane.f32.xlu0 %v1107_v52 }
 0x3c8   :  { %1140 = vadd.xlane.f32.xlu0 %v1109_v34 }
 0x431   :  { %v1115_v53 = vpop.xlane.xlu1 %1114 }
 0x432   :  { %v1144_v11 = vmul.f32 0.03125, %v1115_v53 }
 0x434   :  { %v1160_v56 = vadd.f32 1e-05, %v1144_v11 }
 0x435   :  { %v1111_v57 = vpop.xlane.xlu1 %1110 }
 0x436   :  { %1556 = vrsqrt.f32 %v1160_v56  ;;  %v1142_v50 = vmul.f32 0.03125, %v1111_v57 }
 0x438   :  { %v1158_v12 = vadd.f32 1e-05, %v1142_v50 }
 0x439   :  { %v1123_v9 = vpop.xlane.xlu1 %1122  ;;  %v1117_v10 = vpop.xlane.xlu0 %1116 }
 0x43a   :  { %1558 = vrsqrt.f32 %v1158_v12  ;;  %v1148_v33 = vmul.f32 0.03125, %v1123_v9  ;;  %v1145_v61 = vmul.f32 0.03125, %v1117_v10 }
 0x43c   :  { %v1164_v13 = vadd.f32 1e-05, %v1148_v33  ;;  %v1161_v17 = vadd.f32 1e-05, %v1145_v61 }
 0x43d   :  { %v1119_v14 = vpop.xlane.xlu1 %1118  ;;  %v1113_v54 = vpop.xlane.xlu0 %1112 }
 0x43e   :  { %1560 = vrsqrt.f32 %v1164_v13  ;;  %v1146_v55 = vmul.f32 0.03125, %v1119_v14  ;;  %v1143_v63 = vmul.f32 0.03125, %v1113_v54 }
 0x43f   :  { %1562 = vrsqrt.f32 %v1161_v17 }
 0x440   :  { %v1557_v16 = vpop.eup %1556  ;;  %v1162_v21 = vadd.f32 1e-05, %v1146_v55  ;;  %v1159_v22 = vadd.f32 1e-05, %v1143_v63 }
 0x441   :  { %v1192_v23 = vmul.f32 %v1557_v16, %v2063_v41  ;;  %v1131_v62 = vpop.xlane.xlu1 %1130  ;;  %v1125_v26 = vpop.xlane.xlu0 %1124 }
 0x442   :  { %1564 = vrsqrt.f32 %v1162_v21  ;;  %v1152_v24 = vmul.f32 0.03125, %v1131_v62  ;;  %v1149_v28 = vmul.f32 0.03125, %v1125_v26 }
 0x443   :  { %v1215_v29 = vmul.f32 %v2160_v20, %v1192_v23  ;;  %1566 = vrsqrt.f32 %v1159_v22 }
 0x444   :  { %v1559_v4 = vpop.eup %1558  ;;  %v1168_v1 = vadd.f32 1e-05, %v1152_v24  ;;  %v1165_v47 = vadd.f32 1e-05, %v1149_v28 }
 0x445   :  { %v1238_v25 = vadd.f32 %v2166_v3, %v1215_v29  ;;  %v1190_v41 = vmul.f32 %v1559_v4, %v2069_v51  ;;  %v1127_v0 = vpop.xlane.xlu1 %1126  ;;  %v1121_v7 = vpop.xlane.xlu0 %1120 }
 0x446   :  { %1568 = vrsqrt.f32 %v1168_v1  ;;  %v1150_v35 = vmul.f32 0.03125, %v1127_v0  ;;  %v1147_v36 = vmul.f32 0.03125, %v1121_v7 }
 0x447   :  { %v1254_v37 = vmax.f32 %v1238_v25, 0.0  ;;  %v1213_v38 = vmul.f32 %v2160_v20, %v1190_v41  ;;  %1570 = vrsqrt.f32 %v1165_v47 }
 0x448   :  { %v1561_v40 = vpop.eup %1560  ;;  %v1166_v43 = vadd.f32 1e-05, %v1150_v35  ;;  %v1163_v44 = vadd.f32 1e-05, %v1147_v36 }
 0x449   :  { %v1563_v5 = vpop.eup %1562  ;;  %1270 = vst [vmem:[#allocation9 + $0x10] sm:$0xff] %v1254_v37  ;;  %v1236_v45 = vadd.f32 %v2166_v3, %v1213_v38  ;;  %v1196_v48 = vmul.f32 %v1561_v40, %v2077_v58  ;;  %v1133_v39 = vpop.xlane.xlu0 %1132 }
 0x44a   :  { %v1193_v51 = vmul.f32 %v1563_v5, %v2080_v8  ;;  %1572 = vrsqrt.f32 %v1166_v43  ;;  %v1153_v60 = vmul.f32 0.03125, %v1133_v39  ;;  %v1135_v6 = vpop.xlane.xlu1 %1134 }
 0x44b   :  { %v1252_v52 = vmax.f32 %v1236_v45, 0.0  ;;  %v1219_v34 = vmul.f32 %v2160_v20, %v1196_v48  ;;  %1574 = vrsqrt.f32 %v1163_v44  ;;  %v1154_v53 = vmul.f32 0.03125, %v1135_v6 }
 0x44c   :  { %v1565_v11 = vpop.eup %1564  ;;  %v1216_v56 = vmul.f32 %v2160_v20, %v1193_v51  ;;  %v1169_v57 = vadd.f32 1e-05, %v1153_v60 }
 0x44d   :  { %v1567_v50 = vpop.eup %1566  ;;  %1268 = vst [vmem:[#allocation9] sm:$0xff] %v1252_v52  ;;  %v1242_v12 = vadd.f32 %v2166_v3, %v1219_v34  ;;  %v1194_v58 = vmul.f32 %v1565_v11, %v2092_v15  ;;  %v1170_v9 = vadd.f32 1e-05, %v1154_v53  ;;  %v1129_v8 = vpop.xlane.xlu0 %1128 }
 0x44e   :  { %v1239_v10 = vadd.f32 %v2166_v3, %v1216_v56  ;;  %v1191_v33 = vmul.f32 %v1567_v50, %v2083_v31  ;;  %1576 = vrsqrt.f32 %v1169_v57  ;;  %v1151_v61 = vmul.f32 0.03125, %v1129_v8  ;;  %v1139_v13 = vpop.xlane.xlu1 %1138 }
 0x44f   :  { %v1258_v17 = vmax.f32 %v1242_v12, 0.0  ;;  %v1217_v14 = vmul.f32 %v2160_v20, %v1194_v58  ;;  %1578 = vrsqrt.f32 %v1170_v9  ;;  %v1156_v54 = vmul.f32 0.03125, %v1139_v13 }
 0x450   :  { %v1569_v55 = vpop.eup %1568  ;;  %v1255_v63 = vmax.f32 %v1239_v10, 0.0  ;;  %v1214_v16 = vmul.f32 %v2160_v20, %v1191_v33  ;;  %v1167_v21 = vadd.f32 1e-05, %v1151_v61 }
 0x451   :  { %v1571_v15 = vpop.eup %1570  ;;  %1274 = vst [vmem:[#allocation9 + $0x30] sm:$0xff] %v1258_v17  ;;  %v1240_v22 = vadd.f32 %v2166_v3, %v1217_v14  ;;  %v1200_v23 = vmul.f32 %v1569_v55, %v2104_v59  ;;  %v1172_v31 = vadd.f32 1e-05, %v1156_v54  ;;  %v1137_v62 = vpop.xlane.xlu0 %1136 }
 0x452   :  { %1271 = vst [vmem:[#allocation9 + $0x18] sm:$0xff] %v1255_v63  ;;  %v1237_v26 = vadd.f32 %v2166_v3, %v1214_v16  ;;  %v1197_v24 = vmul.f32 %v1571_v15, %v2095_v32  ;;  %1580 = vrsqrt.f32 %v1167_v21  ;;  %v1155_v28 = vmul.f32 0.03125, %v1137_v62 }
 0x453   :  { %v1256_v29 = vmax.f32 %v1240_v22, 0.0  ;;  %v1223_v4 = vmul.f32 %v2160_v20, %v1200_v23  ;;  %1582 = vrsqrt.f32 %v1172_v31 }
 0x454   :  { %v1573_v1 = vpop.eup %1572  ;;  %v1253_v47 = vmax.f32 %v1237_v26, 0.0  ;;  %v1220_v25 = vmul.f32 %v2160_v20, %v1197_v24  ;;  %v1171_v41 = vadd.f32 1e-05, %v1155_v28 }
 0x455   :  { %v1575_v0 = vpop.eup %1574  ;;  %1272 = vst [vmem:[#allocation9 + $0x20] sm:$0xff] %v1256_v29  ;;  %v1246_v59 = vadd.f32 %v2166_v3, %v1223_v4  ;;  %v1198_v7 = vmul.f32 %v1573_v1, %v2116_v30  ;;  %v1141_v35 = vpop.xlane.xlu0 %1140 }
 0x456   :  { %1269 = vst [vmem:[#allocation9 + $0x8] sm:$0xff] %v1253_v47  ;;  %v1243_v32 = vadd.f32 %v2166_v3, %v1220_v25  ;;  %v1195_v36 = vmul.f32 %v1575_v0, %v2113_v27  ;;  %1584 = vrsqrt.f32 %v1171_v41  ;;  %v1157_v37 = vmul.f32 0.03125, %v1141_v35 }
 0x457   :  { %v1262_v38 = vmax.f32 %v1246_v59, 0.0  ;;  %v1221_v40 = vmul.f32 %v2160_v20, %v1198_v7 }
 0x458   :  { %v1577_v43 = vpop.eup %1576  ;;  %v1259_v44 = vmax.f32 %v1243_v32, 0.0  ;;  %v1218_v5 = vmul.f32 %v2160_v20, %v1195_v36  ;;  %v1173_v45 = vadd.f32 1e-05, %v1157_v37 }
 0x459   :  { %v1579_v48 = vpop.eup %1578  ;;  %1278 = vst [vmem:[#allocation9 + $0x50] sm:$0xff] %v1262_v38  ;;  %v1244_v30 = vadd.f32 %v2166_v3, %v1221_v40  ;;  %v1201_v39 = vmul.f32 %v1577_v43, %v2124_v46 }
 0x45a   :  { %1275 = vst [vmem:[#allocation9 + $0x38] sm:$0xff] %v1259_v44  ;;  %v1241_v51 = vadd.f32 %v2166_v3, %v1218_v5  ;;  %v1202_v27 = vmul.f32 %v1579_v48, %v2128_v42  ;;  %1586 = vrsqrt.f32 %v1173_v45 }
 0x45b   :  { %v1260_v60 = vmax.f32 %v1244_v30, 0.0  ;;  %v1224_v6 = vmul.f32 %v2160_v20, %v1201_v39 }
 0x45c   :  { %v1581_v52 = vpop.eup %1580  ;;  %v1257_v34 = vmax.f32 %v1241_v51, 0.0  ;;  %v1225_v53 = vmul.f32 %v2160_v20, %v1202_v27 }
 0x45d   :  { %v1583_v11 = vpop.eup %1582  ;;  %1276 = vst [vmem:[#allocation9 + $0x40] sm:$0xff] %v1260_v60  ;;  %v1247_v56 = vadd.f32 %v2166_v3, %v1224_v6  ;;  %v1199_v57 = vmul.f32 %v1581_v52, %v2134_v19 }
 0x45e   :  { %1273 = vst [vmem:[#allocation9 + $0x28] sm:$0xff] %v1257_v34  ;;  %v1248_v46 = vadd.f32 %v2166_v3, %v1225_v53  ;;  %v1204_v50 = vmul.f32 %v1583_v11, %v2140_v49 }
 0x45f   :  { %v1263_v42 = vmax.f32 %v1247_v56, 0.0  ;;  %v1222_v12 = vmul.f32 %v2160_v20, %v1199_v57 }
 0x460   :  { %v1585_v58 = vpop.eup %1584  ;;  %v1264_v9 = vmax.f32 %v1248_v46, 0.0  ;;  %v1227_v8 = vmul.f32 %v2160_v20, %v1204_v50 }
 0x461   :  { %1279 = vst [vmem:[#allocation9 + $0x58] sm:$0xff] %v1263_v42  ;;  %v1245_v10 = vadd.f32 %v2166_v3, %v1222_v12  ;;  %v1203_v33 = vmul.f32 %v1585_v58, %v2146_v18 }
 0x462   :  { %1280 = vst [vmem:[#allocation9 + $0x60] sm:$0xff] %v1264_v9  ;;  %v1250_v19 = vadd.f32 %v2166_v3, %v1227_v8 }
 0x463   :  { %v1261_v61 = vmax.f32 %v1245_v10, 0.0  ;;  %v1226_v13 = vmul.f32 %v2160_v20, %v1203_v33 }
 0x464   :  { %v1587_v17 = vpop.eup %1586  ;;  %v1266_v49 = vmax.f32 %v1250_v19, 0.0 }
 0x465   :  { %1277 = vst [vmem:[#allocation9 + $0x48] sm:$0xff] %v1261_v61  ;;  %v1249_v14 = vadd.f32 %v2166_v3, %v1226_v13  ;;  %v1205_v54 = vmul.f32 %v1587_v17, %v2153_v2 }
 0x466   :  { %1282 = vst [vmem:[#allocation9 + $0x70] sm:$0xff] %v1266_v49 }
 0x467   :  { %v1265_v55 = vmax.f32 %v1249_v14, 0.0  ;;  %v1228_v63 = vmul.f32 %v2160_v20, %v1205_v54 }
 0x469   :  { %1281 = vst [vmem:[#allocation9 + $0x68] sm:$0xff] %v1265_v55  ;;  %v1251_v18 = vadd.f32 %v2166_v3, %v1228_v63 }
 0x46b   :  { %v1267_v16 = vmax.f32 %v1251_v18, 0.0 }
 0x46d   :  { %1283 = vst [vmem:[#allocation9 + $0x78] sm:$0xff] %v1267_v16 }
 0x46e   :  { %1621 = shalt.err (!%p1618_p0)
}
 0x46f   :  { %s1622_s24 = scalar_lea.hbm %s2239_s12, 2048 }
 0x470   :  { %p1623_p1 = scmp.ne.s32.totalorder %s2239_s12, %s1622_s24  ;;  %p1626_p2 = scmp.lt.u32.totalorder %s1622_s24, %s2239_s12 }
 0x472   :  { %p1628_p3 = pnand %p1626_p2, %p1623_p1 }
 0x474   :  { %1631 = shalt.err (!%p1628_p3)
}
 0x475   :  { %s1643_s0 = smov 128   ;;  %s1644_s2 = smov 8  }
 0x476   :  { %1295 = dma.vmem_to_hbm [thread:$0]  %s1290_s10, 2048, %s2239_s12, [#allocation8], %s1643_s0, %s1643_s0, %s1644_s2  }
 0x477   :  { %1634 = dma.done.wait [#allocation8], 2048  }
 0x478   :  { %1635 = vsyncadd [#allocation8], 4294965248 }
 0x479   :  { %1299 = vsyncpa [#allocation7], 1 }
 0x47a   :  { %1300 = vsyncpa [#allocation8], 1 }

</bundles_post_ra>
